<compile_context>
chip_gen: v5e
topology: v5e:2x2
jax: 0.10.0
libtpu: 0.0.40
codegen_flags: <defaults>
</compile_context>

<pallas_src>
import functools

import numpy as np
import jax
import jax.numpy as jnp
from jax import lax
from jax.experimental import pallas as pl
from jax.experimental.pallas import tpu as pltpu

ALPHA = 0.1                 # LeakyReLU negative slope (module default)
EPS = 1e-5                  # nn.InstanceNorm3d default eps
KS = 4                      # kernel_size
STRIDE = 2                  # stride
MATMUL_DTYPE = jnp.bfloat16  # MXU operand dtype (f32 accumulation)


# ----------------------------- Pallas kernel --------------------------------
def _upconv_in_lrelu_kernel(x4_ref, w_ref, mask_ref, psum_ref, out_ref, lhs_ref,
                            *, HW, M, alpha, eps, inv_n):
    """Fused upconv + crop-stats InstanceNorm + LeakyReLU, one batch element.

    x4_ref  : (1, Dp*HW, 4*Cin) bf16  padded input, 4 (ah,aw) spatial shifts
                                      concatenated along channels, hw-flattened
    w_ref   : (8*Cin, 8*Cout)  bf16   rows=(ad,ah,aw,ci), cols=(pd,ph,pw,co)
    mask_ref: (M, 8*Cout)      f32    1.0 for voxels surviving the [1:-1] crop
    psum_ref: (8*Cout, 8*Cout) f32    phase-sum projector [i%Cout == j%Cout]
    out_ref : (1, M, 8*Cout)   f32    normalized + activated phase-space output
    lhs_ref : (M, 8*Cin)       bf16   VMEM scratch for the im2col LHS
    """
    C4 = x4_ref.shape[-1]

    # Assemble the (M, 8*Cin) im2col LHS: two depth-shifted, sublane-aligned
    # views of the 4-way channel-concatenated input placed in the two lane
    # halves of the scratch (depth tap ad=0 first, ad=1 second).
    lhs_ref[:, :C4] = x4_ref[0, pl.ds(HW, M), :]   # ad = 0 taps: xpad[jd + 1]
    lhs_ref[:, C4:] = x4_ref[0, pl.ds(0, M), :]    # ad = 1 taps: xpad[jd]

    # Single MXU contraction: (M, 8*Cin) @ (8*Cin, 8*Cout), f32 accumulation.
    acc = jnp.dot(lhs_ref[...], w_ref[...], preferred_element_type=jnp.float32)

    # InstanceNorm statistics restricted to cropped-in voxels (host-built mask).
    accm = acc * mask_ref[...]
    s1 = jnp.sum(accm, axis=0, keepdims=True)            # (1, P)
    s2 = jnp.sum(acc * accm, axis=0, keepdims=True)      # (1, P)

    # Collapse the 8 phases onto channels and re-broadcast across phases with
    # one tiny matmul against the phase-sum projector.
    s1p = jnp.dot(s1, psum_ref[...], preferred_element_type=jnp.float32)
    s2p = jnp.dot(s2, psum_ref[...], preferred_element_type=jnp.float32)
    mean = s1p * inv_n
    var = s2p * inv_n - mean * mean                       # biased variance
    # TODO(synk): single-pass E[x^2]-E[x]^2 can lose precision if |mean|>>std;
    # switch to a two-pass / shifted formulation if real data requires it.
    rstd = lax.rsqrt(var + eps)                           # EUP slot
    scale = rstd                                          # broadcast once
    shift = -mean * rstd

    # Normalize + LeakyReLU; single full-lane-width (128-dense) store.
    t = acc * scale + shift
    out_ref[0] = jnp.where(t >= 0, t, alpha * t)


# --------------------------- host-side constants -----------------------------
def _crop_mask(D, H, W, Cout):
    """(Dq*Hp*Wp, 8*Cout) f32 mask: 1.0 where the voxel survives [1:-1] crop."""
    Dq, Hp, Wp = D + 1, H + 2, W + 2
    jd = np.arange(Dq)[:, None, None, None]
    eh = np.arange(Hp)[None, :, None, None]
    ew = np.arange(Wp)[None, None, :, None]
    ph8 = np.arange(8)[None, None, None, :]
    pd, ph, pw = ph8 // 4, (ph8 // 2) % 2, ph8 % 2
    vd = np.where(pd == 1, jd < D, jd >= 1)
    vh = np.where(ph == 1, eh < H, (eh >= 1) & (eh <= H))
    vw = np.where(pw == 1, ew < W, (ew >= 1) & (ew <= W))
    m = (vd & vh & vw).astype(np.float32)                 # (Dq, Hp, Wp, 8)
    m = np.repeat(m[..., None], Cout, axis=-1)            # (Dq, Hp, Wp, 8, Cout)
    return m.reshape(Dq * Hp * Wp, 8 * Cout)


def _phase_sum_projector(Cout):
    """(P, P) f32 matrix S[i, j] = 1 iff i % Cout == j % Cout."""
    idx = np.arange(8 * Cout)
    return (idx[:, None] % Cout == idx[None, :] % Cout).astype(np.float32)


# ------------------------------ host wrapper ---------------------------------
@jax.jit
def upconv_block_forward(x, weight, bias):
    """x: (B, Cin, D, H, W); weight: (Cin, Cout, 4, 4, 4); bias: (Cout,).

    `bias` is accepted for interface fidelity but is mathematically a no-op:
    a per-channel constant added before InstanceNorm(affine=False) cancels
    exactly in (v - mean) * rstd, so it is dropped (review-approved).
    """
    del bias
    B, Cin, D, H, W = x.shape
    Cout = weight.shape[1]
    Dq, Dp, Hp, Wp = D + 1, D + 2, H + 2, W + 2
    HW = Hp * Wp
    M = Dq * HW
    C4, C8, P = 4 * Cin, 8 * Cin, 8 * Cout
    inv_n = 1.0 / float(8 * D * H * W)

    # ---- XLA prologue: one fused pad / shifted-slice / channel-concat / cast
    xcl = jnp.transpose(x, (0, 2, 3, 4, 1))                       # (B,D,H,W,Cin)
    xpad = jnp.pad(xcl, ((0, 0), (1, 1), (1, 2), (1, 2), (0, 0)))  # (B,Dp,H+3,W+3,Cin)
    shifts = [xpad[:, :, 1 - ah:1 - ah + Hp, 1 - aw:1 - aw + Wp, :]
              for ah in (0, 1) for aw in (0, 1)]
    x4 = jnp.concatenate(shifts, axis=-1).astype(MATMUL_DTYPE)    # (B,Dp,Hp,Wp,4Cin)
    x4 = x4.reshape(B, Dp * HW, C4)

    # One-time weight re-layout: (ci,co,kd,kh,kw) -> (8*Cin, 8*Cout) with
    # k[dim] = phase + 2*shift per spatial dim.
    w8 = weight.reshape(Cin, Cout, 2, 2, 2, 2, 2, 2)   # (ci,co,ad,pd,ah,ph,aw,pw)
    w8 = jnp.transpose(w8, (2, 4, 6, 0, 3, 5, 7, 1))   # (ad,ah,aw,ci,pd,ph,pw,co)
    w_all = w8.reshape(C8, P).astype(MATMUL_DTYPE)

    mask = jnp.asarray(_crop_mask(D, H, W, Cout))       # (M, P) f32, resident
    psum = jnp.asarray(_phase_sum_projector(Cout))      # (P, P) f32, resident

    kernel = functools.partial(_upconv_in_lrelu_kernel, HW=HW, M=M,
                               alpha=ALPHA, eps=EPS, inv_n=inv_n)

    # Explicit VMEM budget (review: v7x has only 64 MiB physical VMEM).
    est = (2 * Dp * HW * C4 * 2                 # double-buffered x4 block (bf16)
           + C8 * P * 2 + M * P * 4 + P * P * 4  # resident weights / mask / projector
           + 2 * M * P * 4                      # double-buffered out block (f32)
           + M * C8 * 2                          # lhs scratch (bf16)
           + 6 * M * P * 4)                      # headroom for f32 intermediates
    vmem_limit = int(min(max(2 * est, 32 * 1024 * 1024), 48 * 1024 * 1024))

    ps = pl.pallas_call(
        kernel,
        out_shape=jax.ShapeDtypeStruct((B, M, P), jnp.float32),
        grid=(B,),
        in_specs=[
            pl.BlockSpec((1, Dp * HW, C4), lambda b: (b, 0, 0)),
            pl.BlockSpec((C8, P), lambda b: (0, 0)),    # weights stay in VMEM
            pl.BlockSpec((M, P), lambda b: (0, 0)),     # crop mask stays in VMEM
            pl.BlockSpec((P, P), lambda b: (0, 0)),     # projector stays in VMEM
        ],
        out_specs=pl.BlockSpec((1, M, P), lambda b: (b, 0, 0)),
        scratch_shapes=[pltpu.VMEM((M, C8), MATMUL_DTYPE)],
        compiler_params=pltpu.CompilerParams(
            dimension_semantics=("parallel",),
            vmem_limit_bytes=vmem_limit),
    )(x4, w_all, mask, psum)
    # TODO(synk): for B == 1 (or odd B) on v7x add a second parallel grid axis
    # over depth/row chunks (partial stats finalized with pl.when) so both
    # TensorCores are fed, and re-tile the (M, P) output block for volumes
    # whose per-step block would exceed v7x's 64 MiB VMEM.

    # ---- XLA epilogue: single interleave-transpose + crop + NCDHW transpose
    y = ps.reshape(B, Dq, Hp, Wp, 2, 2, 2, Cout)         # (..., pd, ph, pw, co)
    y = jnp.transpose(y, (0, 1, 4, 2, 5, 3, 6, 7))       # (B,Dq,2,Hp,2,Wp,2,co)
    y = y.reshape(B, 2 * Dq, 2 * Hp, 2 * Wp, Cout)       # index = 2*plane+phase
    y = y[:, 1:2 * D + 1, 1:2 * H + 1, 1:2 * W + 1, :]   # the [1:-1] crop
    return jnp.transpose(y, (0, 4, 1, 2, 3))             # (B, Cout, 2D, 2H, 2W)


# ------------------------- pure NumPy reference ------------------------------
def _reference_numpy(x, weight, bias, alpha=ALPHA, eps=EPS):
    x = np.asarray(x, np.float64)
    w = np.asarray(weight, np.float64)
    b = np.asarray(bias, np.float64)
    B, Cin, D, H, W = x.shape
    Cout = w.shape[1]
    out = np.zeros((B, Cout, 2 * D + 2, 2 * H + 2, 2 * W + 2), np.float64)
    for kd in range(KS):
        for kh in range(KS):
            for kw in range(KS):
                contrib = np.einsum('bcdhw,co->bodhw', x, w[:, :, kd, kh, kw])
                out[:, :, kd:kd + 2 * D:2, kh:kh + 2 * H:2,
                    kw:kw + 2 * W:2] += contrib
    out += b[None, :, None, None, None]
    out = out[:, :, 1:-1, 1:-1, 1:-1]
    mean = out.mean(axis=(2, 3, 4), keepdims=True)
    var = out.var(axis=(2, 3, 4), keepdims=True)        # biased, like InstanceNorm
    y = (out - mean) / np.sqrt(var + eps)
    return np.where(y >= 0, y, alpha * y)


if __name__ == "__main__":
    B, Cin, Cout, D, H, W = 2, 32, 16, 6, 6, 6          # 8*Cout = 128 lanes
    key = jax.random.PRNGKey(0)
    kx, kw, kb = jax.random.split(key, 3)
    x = jax.random.normal(kx, (B, Cin, D, H, W), jnp.float32)
    bound = 1.0 / np.sqrt(Cin * KS * KS * KS)
    weight = jax.random.uniform(kw, (Cin, Cout, KS, KS, KS), jnp.float32,
                                -bound, bound)
    bias = jax.random.uniform(kb, (Cout,), jnp.float32, -bound, bound)

    out = upconv_block_forward(x, weight, bias)
    out = jax.block_until_ready(out)
    assert out.shape == (B, Cout, 2 * D, 2 * H, 2 * W)
    assert bool(jnp.all(jnp.isfinite(out)))

    # Tolerance loosened from 1e-4 because MXU operands are bfloat16
    # (f32 accumulation); InstanceNorm renormalizes, keeping error ~1e-3.
    ref = _reference_numpy(np.asarray(x), np.asarray(weight), np.asarray(bias))
    np.testing.assert_allclose(np.asarray(out), ref, rtol=2e-2, atol=2e-2)
    print("KERNEL_OK")
</pallas_src>

<mosaic_0001>
module attributes {stable_mosaic.version = 11 : i64} {
  func.func @_upconv_in_lrelu_kernel(%arg0: i32, %arg1: memref<1x512x128xbf16, #tpu.memory_space<vmem>>, %arg2: memref<256x128xbf16, #tpu.memory_space<vmem>>, %arg3: memref<448x128xf32, #tpu.memory_space<vmem>>, %arg4: memref<128x128xf32, #tpu.memory_space<vmem>>, %arg5: memref<1x448x128xf32, #tpu.memory_space<vmem>>, %arg6: memref<448x256xbf16, #tpu.memory_space<vmem>>) attributes {dimension_semantics = [#tpu.dimension_semantics<parallel>], iteration_bounds = array<i64: 2>, scalar_prefetch = 0 : i64, scratch_operands = 1 : i64, tpu.core_type = #tpu.core_type<tc>, window_params = [{transform_indices = @transform_0, window_bounds = array<i64: 1, 512, 128>}, {pipeline_mode = #tpu.pipeline_mode<synchronous>, transform_indices = @transform_1, window_bounds = array<i64: 256, 128>}, {pipeline_mode = #tpu.pipeline_mode<synchronous>, transform_indices = @transform_2, window_bounds = array<i64: 448, 128>}, {pipeline_mode = #tpu.pipeline_mode<synchronous>, transform_indices = @transform_3, window_bounds = array<i64: 128, 128>}, {transform_indices = @transform_4, window_bounds = array<i64: 1, 448, 128>}]} {
    %c0 = arith.constant 0 : index
    %c64 = arith.constant 64 : index
    %c0_0 = arith.constant 0 : index
    %0 = vector.load %arg1[%c0, %c64, %c0_0] : memref<1x512x128xbf16, #tpu.memory_space<vmem>>, vector<1x448x128xbf16>
    %1 = vector.shape_cast %0 : vector<1x448x128xbf16> to vector<448x128xbf16>
    %c0_1 = arith.constant 0 : index
    %c0_2 = arith.constant 0 : index
    %2 = vector.load %arg6[%c0_1, %c0_2] : memref<448x256xbf16, #tpu.memory_space<vmem>>, vector<448x128xbf16>
    tpu.vector_store %arg6[%c0_1, %c0_2], %1 {strides = array<i32>} : memref<448x256xbf16, #tpu.memory_space<vmem>>, vector<448x128xbf16>,
    %c0_3 = arith.constant 0 : index
    %c0_4 = arith.constant 0 : index
    %c0_5 = arith.constant 0 : index
    %3 = vector.load %arg1[%c0_3, %c0_4, %c0_5] : memref<1x512x128xbf16, #tpu.memory_space<vmem>>, vector<1x448x128xbf16>
    %4 = vector.shape_cast %3 : vector<1x448x128xbf16> to vector<448x128xbf16>
    %c0_6 = arith.constant 0 : index
    %c128 = arith.constant 128 : index
    %5 = vector.load %arg6[%c0_6, %c128] : memref<448x256xbf16, #tpu.memory_space<vmem>>, vector<448x128xbf16>
    tpu.vector_store %arg6[%c0_6, %c128], %4 {strides = array<i32>} : memref<448x256xbf16, #tpu.memory_space<vmem>>, vector<448x128xbf16>,
    %c0_7 = arith.constant 0 : index
    %c0_8 = arith.constant 0 : index
    %6 = vector.load %arg6[%c0_7, %c0_8] : memref<448x256xbf16, #tpu.memory_space<vmem>>, vector<448x256xbf16>
    %c0_9 = arith.constant 0 : index
    %c0_10 = arith.constant 0 : index
    %7 = vector.load %arg2[%c0_9, %c0_10] : memref<256x128xbf16, #tpu.memory_space<vmem>>, vector<256x128xbf16>
    %cst = arith.constant dense<0.000000e+00> : vector<448x128xf32>
    %8 = tpu.matmul %6, %7, %cst {dimension_numbers = #tpu.dot_dimension_numbers<[1], [0], [0], [1], [0, 0, 1, 1], [], []>} : vector<448x256xbf16>, vector<256x128xbf16>, vector<448x128xf32> -> vector<448x128xf32>
    %c0_11 = arith.constant 0 : index
    %c0_12 = arith.constant 0 : index
    %9 = vector.load %arg3[%c0_11, %c0_12] : memref<448x128xf32, #tpu.memory_space<vmem>>, vector<448x128xf32>
    %10 = arith.mulf %8, %9 : vector<448x128xf32>
    %cst_13 = arith.constant dense<0.000000e+00> : vector<128xf32>
    %11 = vector.multi_reduction <add>, %10, %cst_13 [0] : vector<448x128xf32> to vector<128xf32>
    %12 = vector.shape_cast %11 : vector<128xf32> to vector<1x128xf32>
    %13 = arith.mulf %8, %10 : vector<448x128xf32>
    %cst_14 = arith.constant dense<0.000000e+00> : vector<128xf32>
    %14 = vector.multi_reduction <add>, %13, %cst_14 [0] : vector<448x128xf32> to vector<128xf32>
    %15 = vector.shape_cast %14 : vector<128xf32> to vector<1x128xf32>
    %c0_15 = arith.constant 0 : index
    %c0_16 = arith.constant 0 : index
    %16 = vector.load %arg4[%c0_15, %c0_16] : memref<128x128xf32, #tpu.memory_space<vmem>>, vector<128x128xf32>
    %cst_17 = arith.constant dense<0.000000e+00> : vector<1x128xf32>
    %17 = tpu.matmul %12, %16, %cst_17 {dimension_numbers = #tpu.dot_dimension_numbers<[1], [0], [0], [1], [0, 0, 1, 1], [], []>} : vector<1x128xf32>, vector<128x128xf32>, vector<1x128xf32> -> vector<1x128xf32>
    %c0_18 = arith.constant 0 : index
    %c0_19 = arith.constant 0 : index
    %18 = vector.load %arg4[%c0_18, %c0_19] : memref<128x128xf32, #tpu.memory_space<vmem>>, vector<128x128xf32>
    %cst_20 = arith.constant dense<0.000000e+00> : vector<1x128xf32>
    %19 = tpu.matmul %15, %18, %cst_20 {dimension_numbers = #tpu.dot_dimension_numbers<[1], [0], [0], [1], [0, 0, 1, 1], [], []>} : vector<1x128xf32>, vector<128x128xf32>, vector<1x128xf32> -> vector<1x128xf32>
    %cst_21 = arith.constant 5.78703708E-4 : f32
    %20 = vector.broadcast %cst_21 : f32 to vector<1x128xf32>
    %21 = arith.mulf %17, %20 : vector<1x128xf32>
    %cst_22 = arith.constant 5.78703708E-4 : f32
    %22 = vector.broadcast %cst_22 : f32 to vector<1x128xf32>
    %23 = arith.mulf %19, %22 : vector<1x128xf32>
    %24 = arith.mulf %21, %21 : vector<1x128xf32>
    %25 = arith.subf %23, %24 : vector<1x128xf32>
    %cst_23 = arith.constant 9.99999974E-6 : f32
    %26 = vector.broadcast %cst_23 : f32 to vector<1x128xf32>
    %27 = arith.addf %25, %26 : vector<1x128xf32>
    %28 = math.rsqrt %27 : vector<1x128xf32>
    %cst_24 = arith.constant 0.000000e+00 : f32
    %29 = vector.broadcast %cst_24 : f32 to vector<1x128xf32>
    %30 = arith.subf %29, %21 : vector<1x128xf32>
    %31 = arith.mulf %30, %28 : vector<1x128xf32>
    %32 = vector.broadcast %28 : vector<1x128xf32> to vector<448x128xf32>
    %33 = arith.mulf %8, %32 : vector<448x128xf32>
    %34 = vector.broadcast %31 : vector<1x128xf32> to vector<448x128xf32>
    %35 = arith.addf %33, %34 : vector<448x128xf32>
    %cst_25 = arith.constant 0.000000e+00 : f32
    %36 = vector.broadcast %cst_25 : f32 to vector<448x128xf32>
    %37 = arith.cmpf oge, %35, %36 : vector<448x128xf32>
    %cst_26 = arith.constant 1.000000e-01 : f32
    %38 = vector.broadcast %cst_26 : f32 to vector<448x128xf32>
    %39 = arith.mulf %38, %35 : vector<448x128xf32>
    %40 = arith.select %37, %35, %39 : vector<448x128xi1>, vector<448x128xf32>
    %c0_27 = arith.constant 0 : index
    %c0_28 = arith.constant 0 : index
    %c0_29 = arith.constant 0 : index
    %41 = vector.load %arg5[%c0_27, %c0_28, %c0_29] : memref<1x448x128xf32, #tpu.memory_space<vmem>>, vector<1x448x128xf32>
    %42 = vector.shape_cast %41 : vector<1x448x128xf32> to vector<448x128xf32>
    %43 = vector.shape_cast %40 : vector<448x128xf32> to vector<1x448x128xf32>
    tpu.vector_store %arg5[%c0_27, %c0_28, %c0_29], %43 {strides = array<i32>} : memref<1x448x128xf32, #tpu.memory_space<vmem>>, vector<1x448x128xf32>,
    return
  }
  func.func @transform_0(%arg0: i32) -> (i32, i32, i32) {
    %c0_i32 = arith.constant 0 : i32
    %c0_i32_0 = arith.constant 0 : i32
    %c0_i32_1 = arith.constant 0 : i32
    return %arg0, %c0_i32, %c0_i32_0 : i32, i32, i32
  }
  func.func @transform_1(%arg0: i32) -> (i32, i32) {
    %c0_i32 = arith.constant 0 : i32
    %c0_i32_0 = arith.constant 0 : i32
    %c0_i32_1 = arith.constant 0 : i32
    return %c0_i32, %c0_i32_0 : i32, i32
  }
  func.func @transform_2(%arg0: i32) -> (i32, i32) {
    %c0_i32 = arith.constant 0 : i32
    %c0_i32_0 = arith.constant 0 : i32
    %c0_i32_1 = arith.constant 0 : i32
    return %c0_i32, %c0_i32_0 : i32, i32
  }
  func.func @transform_3(%arg0: i32) -> (i32, i32) {
    %c0_i32 = arith.constant 0 : i32
    %c0_i32_0 = arith.constant 0 : i32
    %c0_i32_1 = arith.constant 0 : i32
    return %c0_i32, %c0_i32_0 : i32, i32
  }
  func.func @transform_4(%arg0: i32) -> (i32, i32, i32) {
    %c0_i32 = arith.constant 0 : i32
    %c0_i32_0 = arith.constant 0 : i32
    %c0_i32_1 = arith.constant 0 : i32
    return %arg0, %c0_i32, %c0_i32_0 : i32, i32, i32
  }
}

</mosaic_0001>

<bundles_post_ra>
// kernel: upconv_block_forward.1
= control target key start
LH: loop header
LB: loop body
LE: loop exit
PB: predicated region body
PF: predicated region fallthrough
CT: control target
= control target key end

     0   :  { %s2371_s15 = smov 0   ;;  %s3506_s0 = inlined_call_operand.vmem [shape: bf16[2,512,128], index: 0, kind: input, shape index: {}]   ;;  %s3507_s1 = inlined_call_operand.vmem [shape: bf16[256,128], index: 1, kind: input, shape index: {}]   ;;  %s3508_s2 = inlined_call_operand.vmem [shape: f32[448,128], index: 2, kind: input, shape index: {}]   ;;  %s3509_s3 = inlined_call_operand.vmem [shape: f32[128,128], index: 3, kind: input, shape index: {}]   ;;  %s3510_s4 = inlined_call_operand.vmem [shape: f32[2,448,128], index: 4, kind: output, shape index: {}]  }
   0x1 LB: > { %s1940_s16 = sadd.s32 4294967295, %s2344_s15   ;;  %p1944_p0 = scmp.ge.s32.totalorder %s2344_s15, 1  ;;  %s2344_s15 = sphi %s2371_s15, %s14_s15  }
   0x2   : > { %p162_p1 = scmp.lt.s32.totalorder %s2344_s15, 3 }
   0x4   : > { %p163_p2 = pnand %p1944_p0, %p162_p1 }
   0x6   : > { %166 = sbr.rel (%p163_p2) target bundleno = 709 (0x2c5), region = 36 }
   0xb   : > { %v2302_v0 = vld [vmem:[%s3507_s1 + $0x38] sm:$0xff]  ;;  %p188_p3 = scmp.lt.s32.totalorder %s1940_s16, 1  ;;  %v2301_v2 = vld [vmem:[%s3507_s1 + $0x30] sm:$0xff]  ;;  %v2300_v4 = vld [vmem:[%s3507_s1 + $0x28] sm:$0xff] }
   0xc   : > { %v2310_v1 = vld [vmem:[%s3507_s1 + $0x78] sm:$0xff]  ;;  %886 = vmatpush.bf16.msra.mxu0 %v2302_v0  ;;  %v2309_v3 = vld [vmem:[%s3507_s1 + $0x70] sm:$0xff]  ;;  %2311 = vmatpush.bf16.msra.mxu2 %v2302_v0  ;;  %v2308_v5 = vld [vmem:[%s3507_s1 + $0x68] sm:$0xff] }
   0xd   : > { %1035 = vmatpush.bf16.msra.mxu1 %v2310_v1  ;;  %s3587_s16 = smov (!%p188_p3, %s1940_s16), 1  ;;  %2319 = vmatpush.bf16.msra.mxu3 %v2310_v1  ;;  %v2299_v12 = vld [vmem:[%s3507_s1 + $0x20] sm:$0xff]  ;;  %v2298_v16 = vld [vmem:[%s3507_s1 + $0x18] sm:$0xff]  ;;  %v2297_v20 = vld [vmem:[%s3507_s1 + $0x10] sm:$0xff] }
   0xe   : > { %s2238_s25 = sshll.u32 %s3587_s16, 8  ;;  %v2307_v13 = vld [vmem:[%s3507_s1 + $0x60] sm:$0xff]  ;;  %v2306_v17 = vld [vmem:[%s3507_s1 + $0x58] sm:$0xff]  ;;  %v2305_v21 = vld [vmem:[%s3507_s1 + $0x50] sm:$0xff]  ;;  %s2327_s29 = smul.u32 448, %s3587_s16 }
   0xf   : > { %s2403_s6 = scalar_lea.vmem %s3506_s0, %s2238_s25  ;;  %v2296_v22 = vld [vmem:[%s3507_s1 + $0x8] sm:$0xff]  ;;  %v2295_v26 = vld [vmem:[%s3507_s1] sm:$0xff] }
  0x10   : > { %887 = vmatpush.bf16.msra.mxu0 %v2301_v2  ;;  %v198_v6 = vld [vmem:[%s2403_s6 + $0x20] sm:$0xf]  ;;  %v199_v7 = vld [vmem:[%s2403_s6 + $0x24] sm:$0xf]  ;;  %2312 = vmatpush.bf16.msra.mxu2 %v2301_v2  ;;  %v200_v10 = vld [vmem:[%s2403_s6 + $0x28] sm:$0xf]  ;;  %s3140_s16 = scalar_lea.vmem %s3510_s4, %s2327_s29 }
  0x11   : > { %1036 = vmatpush.bf16.msra.mxu1 %v2309_v3  ;;  %v310_v8 = vld [vmem:[%s2403_s6] sm:$0xf]  ;;  %254 = vst [vmem:[#allocation2] sm:$0xf] %v198_v6  ;;  %v311_v9 = vld [vmem:[%s2403_s6 + $0x4] sm:$0xf]  ;;  %2320 = vmatpush.bf16.msra.mxu3 %v2309_v3 }
  0x12   : > { %255 = vst [vmem:[#allocation2 + $0x8] sm:$0xf] %v199_v7  ;;  %v201_v11 = vld [vmem:[%s2403_s6 + $0x2c] sm:$0xf]  ;;  %v312_v14 = vld [vmem:[%s2403_s6 + $0x8] sm:$0xf] }
  0x13   : > { %366 = vst [vmem:[#allocation2 + $0x4] sm:$0xf] %v310_v8  ;;  %v313_v15 = vld [vmem:[%s2403_s6 + $0xc] sm:$0xf]  ;;  %v202_v18 = vld [vmem:[%s2403_s6 + $0x30] sm:$0xf] }
  0x14   : > { %888 = vmatpush.bf16.msra.mxu0 %v2300_v4  ;;  %367 = vst [vmem:[#allocation2 + $0xc] sm:$0xf] %v311_v9  ;;  %2313 = vmatpush.bf16.msra.mxu2 %v2300_v4  ;;  %v203_v19 = vld [vmem:[%s2403_s6 + $0x34] sm:$0xf]  ;;  %v2304_v23 = vld [vmem:[%s3507_s1 + $0x48] sm:$0xff]  ;;  %v2303_v27 = vld [vmem:[%s3507_s1 + $0x40] sm:$0xff] }
  0x15   : > { %1037 = vmatpush.bf16.msra.mxu1 %v2308_v5  ;;  %256 = vst [vmem:[#allocation2 + $0x10] sm:$0xf] %v200_v10  ;;  %2321 = vmatpush.bf16.msra.mxu3 %v2308_v5  ;;  %v314_v24 = vld [vmem:[%s2403_s6 + $0x10] sm:$0xf]  ;;  %v315_v25 = vld [vmem:[%s2403_s6 + $0x14] sm:$0xf] }
  0x16   : > { %257 = vst [vmem:[#allocation2 + $0x18] sm:$0xf] %v201_v11  ;;  %v204_v34 = vld [vmem:[%s2403_s6 + $0x38] sm:$0xf]  ;;  %v205_v35 = vld [vmem:[%s2403_s6 + $0x3c] sm:$0xf] }
  0x17   : > { %368 = vst [vmem:[#allocation2 + $0x14] sm:$0xf] %v312_v14  ;;  %v316_v36 = vld [vmem:[%s2403_s6 + $0x18] sm:$0xf]  ;;  %v317_v37 = vld [vmem:[%s2403_s6 + $0x1c] sm:$0xf] }
  0x18   : > { %889 = vmatpush.bf16.msra.mxu0 %v2299_v12  ;;  %369 = vst [vmem:[#allocation2 + $0x1c] sm:$0xf] %v313_v15  ;;  %2314 = vmatpush.bf16.msra.mxu2 %v2299_v12  ;;  %v1950_v28 = vld [vmem:[#allocation2] sm:$0xf]  ;;  %v207_v45 = vld [vmem:[%s2403_s6 + $0x44] sm:$0xf] }
  0x19   : > { %1038 = vmatpush.bf16.msra.mxu1 %v2307_v13  ;;  %2322 = vmatpush.bf16.msra.mxu3 %v2307_v13  ;;  %258 = vst [vmem:[#allocation2 + $0x20] sm:$0xf] %v202_v18  ;;  %v2240_v29 = vld [vmem:[#allocation2 + $0x4] sm:$0xf0]  ;;  %v206_v44 = vld [vmem:[%s2403_s6 + $0x40] sm:$0xf] }
  0x1a   : > { %259 = vst [vmem:[#allocation2 + $0x28] sm:$0xf] %v203_v19  ;;  %v2239_v30 = vld [vmem:[#allocation2 + $0x4] sm:$0xf]  ;;  %v1951_v32 = vor.u32 %v2240_v29, %v1950_v28  ;;  %v318_v46 = vld [vmem:[%s2403_s6 + $0x20] sm:$0xf] }
  0x1b   : > { %370 = vst [vmem:[#allocation2 + $0x24] sm:$0xf] %v314_v24  ;;  %v1952_v31 = vld [vmem:[#allocation2 + $0x8] sm:$0xf0]  ;;  %v319_v47 = vld [vmem:[%s2403_s6 + $0x24] sm:$0xf] }
  0x1c   : > { %890 = vmatpush.bf16.msra.mxu0 %v2298_v16  ;;  %2315 = vmatpush.bf16.msra.mxu2 %v2298_v16  ;;  %371 = vst [vmem:[#allocation2 + $0x2c] sm:$0xf] %v315_v25  ;;  %v1955_v33 = vor.u32 %v2239_v30, %v1952_v31  ;;  %v1958_v38 = vld [vmem:[#allocation2 + $0x10] sm:$0xf]  ;;  %v228_v52 = vld [vmem:[%s2403_s6 + $0x98] sm:$0xf] }
  0x1d   : > { %1039 = vmatpush.bf16.msra.mxu1 %v2306_v17  ;;  %2323 = vmatpush.bf16.msra.mxu3 %v2306_v17  ;;  %260 = vst [vmem:[#allocation2 + $0x30] sm:$0xf] %v204_v34  ;;  %v2242_v39 = vld [vmem:[#allocation2 + $0x14] sm:$0xf0]  ;;  %v229_v53 = vld [vmem:[%s2403_s6 + $0x9c] sm:$0xf] }
  0x1e   : > { %261 = vst [vmem:[#allocation2 + $0x38] sm:$0xf] %v205_v35  ;;  %v2241_v40 = vld [vmem:[#allocation2 + $0x14] sm:$0xf]  ;;  %v1959_v42 = vor.u32 %v2242_v39, %v1958_v38  ;;  %v340_v54 = vld [vmem:[%s2403_s6 + $0x78] sm:$0xf] }
  0x1f   : > { %372 = vst [vmem:[#allocation2 + $0x34] sm:$0xf] %v316_v36  ;;  %v1960_v41 = vld [vmem:[#allocation2 + $0x18] sm:$0xf0]  ;;  %v208_v58 = vld [vmem:[%s2403_s6 + $0x48] sm:$0xf] }
  0x20   : > { %891 = vmatpush.bf16.msra.mxu0 %v2297_v20  ;;  %2316 = vmatpush.bf16.msra.mxu2 %v2297_v20  ;;  %373 = vst [vmem:[#allocation2 + $0x3c] sm:$0xf] %v317_v37  ;;  %v1963_v43 = vor.u32 %v2241_v40, %v1960_v41  ;;  %v1966_v48 = vld [vmem:[#allocation2 + $0x20] sm:$0xf]  ;;  %v341_v55 = vld [vmem:[%s2403_s6 + $0x7c] sm:$0xf] }
  0x21   : > { %1040 = vmatpush.bf16.msra.mxu1 %v2305_v21  ;;  %2324 = vmatpush.bf16.msra.mxu3 %v2305_v21  ;;  %262 = vst [vmem:[#allocation2 + $0x40] sm:$0xf] %v206_v44  ;;  %v2244_v49 = vld [vmem:[#allocation2 + $0x24] sm:$0xf0]  ;;  %v209_v59 = vld [vmem:[%s2403_s6 + $0x4c] sm:$0xf] }
  0x22   : > { %263 = vst [vmem:[#allocation2 + $0x48] sm:$0xf] %v207_v45  ;;  %v2243_v50 = vld [vmem:[#allocation2 + $0x24] sm:$0xf]  ;;  %v1967_v56 = vor.u32 %v2244_v49, %v1966_v48  ;;  %v320_v2 = vld [vmem:[%s2403_s6 + $0x28] sm:$0xf] }
  0x23   : > { %374 = vst [vmem:[#allocation2 + $0x44] sm:$0xf] %v318_v46  ;;  %v1968_v51 = vld [vmem:[#allocation2 + $0x28] sm:$0xf0]  ;;  %v230_v8 = vld [vmem:[%s2403_s6 + $0xa0] sm:$0xf] }
  0x24   : > { %892 = vmatpush.bf16.msra.mxu0 %v2296_v22  ;;  %2317 = vmatpush.bf16.msra.mxu2 %v2296_v22  ;;  %375 = vst [vmem:[#allocation2 + $0x4c] sm:$0xf] %v319_v47  ;;  %v1971_v57 = vor.u32 %v2243_v50, %v1968_v51  ;;  %v321_v3 = vld [vmem:[%s2403_s6 + $0x2c] sm:$0xf]  ;;  %v1974_v4 = vld [vmem:[#allocation2 + $0x30] sm:$0xf] }
  0x25   : > { %1041 = vmatpush.bf16.msra.mxu1 %v2304_v23  ;;  %2325 = vmatpush.bf16.msra.mxu3 %v2304_v23  ;;  %284 = vst [vmem:[#allocation2 + $0xf0] sm:$0xf] %v228_v52  ;;  %v2246_v5 = vld [vmem:[#allocation2 + $0x34] sm:$0xf0]  ;;  %v231_v9 = vld [vmem:[%s2403_s6 + $0xa4] sm:$0xf] }
  0x26   : > { %285 = vst [vmem:[#allocation2 + $0xf8] sm:$0xf] %v229_v53  ;;  %v2245_v6 = vld [vmem:[#allocation2 + $0x34] sm:$0xf]  ;;  %v342_v10 = vld [vmem:[%s2403_s6 + $0x80] sm:$0xf]  ;;  %v1975_v12 = vor.u32 %v2246_v5, %v1974_v4 }
  0x27   : > { %396 = vst [vmem:[#allocation2 + $0xf4] sm:$0xf] %v340_v54  ;;  %v1976_v7 = vld [vmem:[#allocation2 + $0x38] sm:$0xf0]  ;;  %v343_v11 = vld [vmem:[%s2403_s6 + $0x84] sm:$0xf] }
  0x28   : > { %893 = vmatpush.bf16.msra.mxu0 %v2295_v26  ;;  %2318 = vmatpush.bf16.msra.mxu2 %v2295_v26  ;;  %397 = vst [vmem:[#allocation2 + $0xfc] sm:$0xf] %v341_v55  ;;  %v1979_v13 = vor.u32 %v2245_v6, %v1976_v7  ;;  %v210_v14 = vld [vmem:[%s2403_s6 + $0x50] sm:$0xf]  ;;  %v211_v15 = vld [vmem:[%s2403_s6 + $0x54] sm:$0xf] }
  0x29   : > { %1042 = vmatpush.bf16.msra.mxu1 %v2303_v27  ;;  %2326 = vmatpush.bf16.msra.mxu3 %v2303_v27  ;;  %264 = vst [vmem:[#allocation2 + $0x50] sm:$0xf] %v208_v58  ;;  %v322_v22 = vld [vmem:[%s2403_s6 + $0x30] sm:$0xf]  ;;  %v323_v23 = vld [vmem:[%s2403_s6 + $0x34] sm:$0xf] }
  0x2a   : > { %265 = vst [vmem:[#allocation2 + $0x58] sm:$0xf] %v209_v59  ;;  %v1982_v24 = vld [vmem:[#allocation2 + $0x40] sm:$0xf]  ;;  %v2248_v25 = vld [vmem:[#allocation2 + $0x44] sm:$0xf0] }
  0x2b   : > { %894 = vmatmul.bf16.vlgmr.msra.gmra.mxu0 %v1951_v32  ;;  %376 = vst [vmem:[#allocation2 + $0x54] sm:$0xf] %v320_v2  ;;  %v2247_v26 = vld [vmem:[#allocation2 + $0x44] sm:$0xf]  ;;  %v1984_v27 = vld [vmem:[#allocation2 + $0x48] sm:$0xf0]  ;;  %v1983_v32 = vor.u32 %v2248_v25, %v1982_v24 }
  0x2c   : > { %1043 = vmatmul.bf16.vlgmr.msra.gmra.mxu1 %v1955_v33  ;;  %v2070_v60 = vld [vmem:[#allocation2 + $0xf0] sm:$0xf]  ;;  %377 = vst [vmem:[#allocation2 + $0x5c] sm:$0xf] %v321_v3  ;;  %v232_v28 = vld [vmem:[%s2403_s6 + $0xa8] sm:$0xf]  ;;  %v1987_v33 = vor.u32 %v2247_v26, %v1984_v27 }
  0x2d   : > { %v2270_v61 = vld [vmem:[#allocation2 + $0xf4] sm:$0xf0]  ;;  %286 = vst [vmem:[#allocation2 + $0x100] sm:$0xf] %v230_v8  ;;  %v233_v29 = vld [vmem:[%s2403_s6 + $0xac] sm:$0xf] }
  0x2e   : > { %v2071_v62 = vor.u32 %v2270_v61, %v2070_v60  ;;  %v2269_v63 = vld [vmem:[#allocation2 + $0xf4] sm:$0xf]  ;;  %287 = vst [vmem:[#allocation2 + $0x108] sm:$0xf] %v231_v9  ;;  %v344_v30 = vld [vmem:[%s2403_s6 + $0x88] sm:$0xf] }
  0x2f   : > { %v2072_v0 = vld [vmem:[#allocation2 + $0xf8] sm:$0xf0]  ;;  %398 = vst [vmem:[#allocation2 + $0x104] sm:$0xf] %v342_v10  ;;  %v345_v31 = vld [vmem:[%s2403_s6 + $0x8c] sm:$0xf] }
  0x30   : > { %969 = vmatmul.bf16.vlgmr.msra.gmra.mxu2 %v2071_v62  ;;  %v2075_v1 = vor.u32 %v2269_v63, %v2072_v0  ;;  %399 = vst [vmem:[#allocation2 + $0x10c] sm:$0xf] %v343_v11  ;;  %v212_v34 = vld [vmem:[%s2403_s6 + $0x58] sm:$0xf]  ;;  %v213_v35 = vld [vmem:[%s2403_s6 + $0x5c] sm:$0xf] }
  0x31   : > { %266 = vst [vmem:[#allocation2 + $0x60] sm:$0xf] %v210_v14  ;;  %v1990_v44 = vld [vmem:[#allocation2 + $0x50] sm:$0xf]  ;;  %v2250_v45 = vld [vmem:[#allocation2 + $0x54] sm:$0xf0] }
  0x32   : > { %1118 = vmatmul.bf16.vlgmr.msra.gmra.mxu3 %v2075_v1  ;;  %267 = vst [vmem:[#allocation2 + $0x68] sm:$0xf] %v211_v15  ;;  %v2249_v46 = vld [vmem:[#allocation2 + $0x54] sm:$0xf]  ;;  %v234_v48 = vld [vmem:[%s2403_s6 + $0xb0] sm:$0xf]  ;;  %v1991_v52 = vor.u32 %v2250_v45, %v1990_v44 }
  0x33   : > { %378 = vst [vmem:[#allocation2 + $0x64] sm:$0xf] %v322_v22  ;;  %v1992_v47 = vld [vmem:[#allocation2 + $0x58] sm:$0xf0]  ;;  %v235_v49 = vld [vmem:[%s2403_s6 + $0xb4] sm:$0xf] }
  0x34   : > { %v2078_v16 = vld [vmem:[#allocation2 + $0x100] sm:$0xf]  ;;  %379 = vst [vmem:[#allocation2 + $0x6c] sm:$0xf] %v323_v23  ;;  %v346_v50 = vld [vmem:[%s2403_s6 + $0x90] sm:$0xf]  ;;  %v1995_v53 = vor.u32 %v2249_v46, %v1992_v47 }
  0x35   : > { %v2272_v17 = vld [vmem:[#allocation2 + $0x104] sm:$0xf0]  ;;  %288 = vst [vmem:[#allocation2 + $0x110] sm:$0xf] %v232_v28  ;;  %v347_v51 = vld [vmem:[%s2403_s6 + $0x94] sm:$0xf] }
  0x36   : > { %v2079_v18 = vor.u32 %v2272_v17, %v2078_v16  ;;  %v2271_v19 = vld [vmem:[#allocation2 + $0x104] sm:$0xf]  ;;  %289 = vst [vmem:[#allocation2 + $0x118] sm:$0xf] %v233_v29  ;;  %v214_v60 = vld [vmem:[%s2403_s6 + $0x60] sm:$0xf] }
  0x37   : > { %v2080_v20 = vld [vmem:[#allocation2 + $0x108] sm:$0xf0]  ;;  %400 = vst [vmem:[#allocation2 + $0x114] sm:$0xf] %v344_v30  ;;  %v215_v61 = vld [vmem:[%s2403_s6 + $0x64] sm:$0xf] }
  0x38   : > { %v2083_v21 = vor.u32 %v2271_v19, %v2080_v20  ;;  %401 = vst [vmem:[#allocation2 + $0x11c] sm:$0xf] %v345_v31  ;;  %v326_v62 = vld [vmem:[%s2403_s6 + $0x40] sm:$0xf]  ;;  %v327_v63 = vld [vmem:[%s2403_s6 + $0x44] sm:$0xf] }
  0x39   : > { %268 = vst [vmem:[#allocation2 + $0x70] sm:$0xf] %v212_v34  ;;  %v1998_v0 = vld [vmem:[#allocation2 + $0x60] sm:$0xf]  ;;  %v2252_v1 = vld [vmem:[#allocation2 + $0x64] sm:$0xf0] }
  0x3a   : > { %269 = vst [vmem:[#allocation2 + $0x78] sm:$0xf] %v213_v35  ;;  %v2251_v2 = vld [vmem:[#allocation2 + $0x64] sm:$0xf]  ;;  %v236_v4 = vld [vmem:[%s2403_s6 + $0xb8] sm:$0xf]  ;;  %v1999_v8 = vor.u32 %v2252_v1, %v1998_v0 }
  0x3b   : > { %899 = vmatmul.bf16.gmra.mxu0 %v1959_v42  ;;  %v324_v42 = vld [vmem:[%s2403_s6 + $0x38] sm:$0xf]  ;;  %290 = vst [vmem:[#allocation2 + $0x120] sm:$0xf] %v234_v48  ;;  %v2000_v3 = vld [vmem:[#allocation2 + $0x68] sm:$0xf0] }
  0x3c   : > { %1048 = vmatmul.bf16.gmra.mxu1 %v1963_v43  ;;  %v2086_v36 = vld [vmem:[#allocation2 + $0x110] sm:$0xf]  ;;  %v325_v43 = vld [vmem:[%s2403_s6 + $0x3c] sm:$0xf]  ;;  %380 = vst [vmem:[#allocation2 + $0x74] sm:$0xf] %v324_v42  ;;  %v2003_v9 = vor.u32 %v2251_v2, %v2000_v3 }
  0x3d   : > { %v2274_v37 = vld [vmem:[#allocation2 + $0x114] sm:$0xf0]  ;;  %381 = vst [vmem:[#allocation2 + $0x7c] sm:$0xf] %v325_v43  ;;  %v237_v5 = vld [vmem:[%s2403_s6 + $0xbc] sm:$0xf] }
  0x3e   : > { %v2087_v38 = vor.u32 %v2274_v37, %v2086_v36  ;;  %v2273_v39 = vld [vmem:[#allocation2 + $0x114] sm:$0xf]  ;;  %291 = vst [vmem:[#allocation2 + $0x128] sm:$0xf] %v235_v49  ;;  %v348_v6 = vld [vmem:[%s2403_s6 + $0x98] sm:$0xf] }
  0x3f   : > { %v2088_v40 = vld [vmem:[#allocation2 + $0x118] sm:$0xf0]  ;;  %402 = vst [vmem:[#allocation2 + $0x124] sm:$0xf] %v346_v50  ;;  %v216_v16 = vld [vmem:[%s2403_s6 + $0x68] sm:$0xf] }
  0x40   : > { %974 = vmatmul.bf16.gmra.mxu2 %v2079_v18  ;;  %v2091_v41 = vor.u32 %v2273_v39, %v2088_v40  ;;  %403 = vst [vmem:[#allocation2 + $0x12c] sm:$0xf] %v347_v51  ;;  %v349_v7 = vld [vmem:[%s2403_s6 + $0x9c] sm:$0xf]  ;;  %v217_v17 = vld [vmem:[%s2403_s6 + $0x6c] sm:$0xf] }
  0x41   : > { %270 = vst [vmem:[#allocation2 + $0x80] sm:$0xf] %v214_v60  ;;  %v328_v18 = vld [vmem:[%s2403_s6 + $0x48] sm:$0xf]  ;;  %v329_v19 = vld [vmem:[%s2403_s6 + $0x4c] sm:$0xf] }
  0x42   : > { %1123 = vmatmul.bf16.gmra.mxu3 %v2083_v21  ;;  %v2094_v54 = vld [vmem:[#allocation2 + $0x120] sm:$0xf]  ;;  %271 = vst [vmem:[#allocation2 + $0x88] sm:$0xf] %v215_v61  ;;  %v2006_v20 = vld [vmem:[#allocation2 + $0x70] sm:$0xf] }
  0x43   : > { %382 = vst [vmem:[#allocation2 + $0x84] sm:$0xf] %v326_v62  ;;  %v2254_v21 = vld [vmem:[#allocation2 + $0x74] sm:$0xf0]  ;;  %v2253_v22 = vld [vmem:[#allocation2 + $0x74] sm:$0xf] }
  0x44   : > { %383 = vst [vmem:[#allocation2 + $0x8c] sm:$0xf] %v327_v63  ;;  %v2008_v23 = vld [vmem:[#allocation2 + $0x78] sm:$0xf0]  ;;  %v238_v24 = vld [vmem:[%s2403_s6 + $0xc0] sm:$0xf]  ;;  %v2007_v28 = vor.u32 %v2254_v21, %v2006_v20 }
  0x45   : > { %v2276_v55 = vld [vmem:[#allocation2 + $0x124] sm:$0xf0]  ;;  %292 = vst [vmem:[#allocation2 + $0x130] sm:$0xf] %v236_v4  ;;  %v239_v25 = vld [vmem:[%s2403_s6 + $0xc4] sm:$0xf]  ;;  %v2011_v29 = vor.u32 %v2253_v22, %v2008_v23 }
  0x46   : > { %293 = vst [vmem:[#allocation2 + $0x138] sm:$0xf] %v237_v5  ;;  %v350_v26 = vld [vmem:[%s2403_s6 + $0xa0] sm:$0xf]  ;;  %v351_v27 = vld [vmem:[%s2403_s6 + $0xa4] sm:$0xf] }
  0x47   : > { %v2096_v58 = vld [vmem:[#allocation2 + $0x128] sm:$0xf0]  ;;  %404 = vst [vmem:[#allocation2 + $0x134] sm:$0xf] %v348_v6  ;;  %v218_v36 = vld [vmem:[%s2403_s6 + $0x70] sm:$0xf] }
  0x48   : > { %405 = vst [vmem:[#allocation2 + $0x13c] sm:$0xf] %v349_v7  ;;  %v219_v37 = vld [vmem:[%s2403_s6 + $0x74] sm:$0xf]  ;;  %v2014_v40 = vld [vmem:[#allocation2 + $0x80] sm:$0xf] }
  0x49   : > { %272 = vst [vmem:[#allocation2 + $0x90] sm:$0xf] %v216_v16  ;;  %v331_v39 = vld [vmem:[%s2403_s6 + $0x54] sm:$0xf]  ;;  %v240_v44 = vld [vmem:[%s2403_s6 + $0xc8] sm:$0xf] }
  0x4a   : > { %273 = vst [vmem:[#allocation2 + $0x98] sm:$0xf] %v217_v17  ;;  %v2255_v42 = vld [vmem:[#allocation2 + $0x84] sm:$0xf]  ;;  %v241_v45 = vld [vmem:[%s2403_s6 + $0xcc] sm:$0xf] }
  0x4b   : > { %904 = vmatmul.bf16.gmra.mxu0 %v1967_v56  ;;  %v2095_v56 = vor.u32 %v2276_v55, %v2094_v54  ;;  %384 = vst [vmem:[#allocation2 + $0x94] sm:$0xf] %v328_v18  ;;  %v2016_v43 = vld [vmem:[#allocation2 + $0x88] sm:$0xf0]  ;;  %v352_v46 = vld [vmem:[%s2403_s6 + $0xa8] sm:$0xf] }
  0x4c   : > { %1053 = vmatmul.bf16.gmra.mxu1 %v1971_v57  ;;  %v2275_v57 = vld [vmem:[#allocation2 + $0x124] sm:$0xf]  ;;  %v2102_v10 = vld [vmem:[#allocation2 + $0x130] sm:$0xf]  ;;  %385 = vst [vmem:[#allocation2 + $0x9c] sm:$0xf] %v329_v19  ;;  %v2019_v49 = vor.u32 %v2255_v42, %v2016_v43 }
  0x4d   : > { %v2099_v59 = vor.u32 %v2275_v57, %v2096_v58  ;;  %v2278_v11 = vld [vmem:[#allocation2 + $0x134] sm:$0xf0]  ;;  %294 = vst [vmem:[#allocation2 + $0x140] sm:$0xf] %v238_v24  ;;  %v353_v47 = vld [vmem:[%s2403_s6 + $0xac] sm:$0xf] }
  0x4e   : > { %295 = vst [vmem:[#allocation2 + $0x148] sm:$0xf] %v239_v25  ;;  %v220_v61 = vld [vmem:[%s2403_s6 + $0x78] sm:$0xf]  ;;  %v221_v62 = vld [vmem:[%s2403_s6 + $0x7c] sm:$0xf] }
  0x4f   : > { %v2104_v14 = vld [vmem:[#allocation2 + $0x138] sm:$0xf0]  ;;  %406 = vst [vmem:[#allocation2 + $0x144] sm:$0xf] %v350_v26  ;;  %v332_v63 = vld [vmem:[%s2403_s6 + $0x58] sm:$0xf] }
  0x50   : > { %979 = vmatmul.bf16.gmra.mxu2 %v2087_v38  ;;  %407 = vst [vmem:[#allocation2 + $0x14c] sm:$0xf] %v351_v27  ;;  %v330_v38 = vld [vmem:[%s2403_s6 + $0x50] sm:$0xf]  ;;  %v333_v1 = vld [vmem:[%s2403_s6 + $0x5c] sm:$0xf] }
  0x51   : > { %274 = vst [vmem:[#allocation2 + $0xa0] sm:$0xf] %v218_v36  ;;  %v2022_v2 = vld [vmem:[#allocation2 + $0x90] sm:$0xf]  ;;  %v2258_v3 = vld [vmem:[#allocation2 + $0x94] sm:$0xf0] }
  0x52   : > { %1128 = vmatmul.bf16.gmra.mxu3 %v2091_v41  ;;  %v2256_v41 = vld [vmem:[#allocation2 + $0x84] sm:$0xf0]  ;;  %275 = vst [vmem:[#allocation2 + $0xa8] sm:$0xf] %v219_v37  ;;  %v2257_v4 = vld [vmem:[#allocation2 + $0x94] sm:$0xf] }
  0x53   : > { %386 = vst [vmem:[#allocation2 + $0xa4] sm:$0xf] %v330_v38  ;;  %v2015_v48 = vor.u32 %v2256_v41, %v2014_v40  ;;  %v2024_v5 = vld [vmem:[#allocation2 + $0x98] sm:$0xf0]  ;;  %v242_v6 = vld [vmem:[%s2403_s6 + $0xd0] sm:$0xf] }
  0x54   : > { %v2110_v30 = vld [vmem:[#allocation2 + $0x140] sm:$0xf]  ;;  %387 = vst [vmem:[#allocation2 + $0xac] sm:$0xf] %v331_v39  ;;  %v243_v7 = vld [vmem:[%s2403_s6 + $0xd4] sm:$0xf] }
  0x55   : > { %v2280_v31 = vld [vmem:[#allocation2 + $0x144] sm:$0xf0]  ;;  %296 = vst [vmem:[#allocation2 + $0x150] sm:$0xf] %v240_v44  ;;  %v222_v23 = vld [vmem:[%s2403_s6 + $0x80] sm:$0xf] }
  0x56   : > { %297 = vst [vmem:[#allocation2 + $0x158] sm:$0xf] %v241_v45  ;;  %v223_v24 = vld [vmem:[%s2403_s6 + $0x84] sm:$0xf]  ;;  %v334_v25 = vld [vmem:[%s2403_s6 + $0x60] sm:$0xf] }
  0x57   : > { %v2112_v34 = vld [vmem:[#allocation2 + $0x148] sm:$0xf0]  ;;  %408 = vst [vmem:[#allocation2 + $0x154] sm:$0xf] %v352_v46  ;;  %v335_v27 = vld [vmem:[%s2403_s6 + $0x64] sm:$0xf] }
  0x58   : > { %409 = vst [vmem:[#allocation2 + $0x15c] sm:$0xf] %v353_v47 }
  0x59   : > { %276 = vst [vmem:[#allocation2 + $0xb0] sm:$0xf] %v220_v61  ;;  %v247_v61 = vld [vmem:[%s2403_s6 + $0xe4] sm:$0xf] }
  0x5a   : > { %277 = vst [vmem:[#allocation2 + $0xb8] sm:$0xf] %v221_v62 }
  0x5b   : > { %909 = vmatmul.bf16.gmra.mxu0 %v1975_v12  ;;  %v2103_v12 = vor.u32 %v2278_v11, %v2102_v10  ;;  %388 = vst [vmem:[#allocation2 + $0xb4] sm:$0xf] %v332_v63  ;;  %v2023_v10 = vor.u32 %v2258_v3, %v2022_v2  ;;  %v2027_v11 = vor.u32 %v2257_v4, %v2024_v5  ;;  %v358_v63 = vld [vmem:[%s2403_s6 + $0xc0] sm:$0xf] }
  0x5c   : > { %1058 = vmatmul.bf16.gmra.mxu1 %v1979_v13  ;;  %v2277_v13 = vld [vmem:[#allocation2 + $0x134] sm:$0xf]  ;;  %389 = vst [vmem:[#allocation2 + $0xbc] sm:$0xf] %v333_v1  ;;  %v359_v1 = vld [vmem:[%s2403_s6 + $0xc4] sm:$0xf] }
  0x5d   : > { %v2107_v15 = vor.u32 %v2277_v13, %v2104_v14  ;;  %v2282_v54 = vld [vmem:[#allocation2 + $0x154] sm:$0xf0]  ;;  %298 = vst [vmem:[#allocation2 + $0x160] sm:$0xf] %v242_v6 }
  0x5e   : > { %299 = vst [vmem:[#allocation2 + $0x168] sm:$0xf] %v243_v7 }
  0x5f   : > { %v2120_v57 = vld [vmem:[#allocation2 + $0x158] sm:$0xf0]  ;;  %278 = vst [vmem:[#allocation2 + $0xc0] sm:$0xf] %v222_v23 }
  0x60   : > { %984 = vmatmul.bf16.gmra.mxu2 %v2095_v56  ;;  %v2281_v56 = vld [vmem:[#allocation2 + $0x154] sm:$0xf]  ;;  %279 = vst [vmem:[#allocation2 + $0xc8] sm:$0xf] %v223_v24 }
  0x61   : > { %v2123_v60 = vor.u32 %v2281_v56, %v2120_v57  ;;  %390 = vst [vmem:[#allocation2 + $0xc4] sm:$0xf] %v334_v25  ;;  %v2262_v56 = vld [vmem:[#allocation2 + $0xb4] sm:$0xf0]  ;;  %v339_v24 = vld [vmem:[%s2403_s6 + $0x74] sm:$0xf] }
  0x62   : > { %1133 = vmatmul.bf16.gmra.mxu3 %v2099_v59  ;;  %391 = vst [vmem:[#allocation2 + $0xcc] sm:$0xf] %v335_v27  ;;  %v2261_v57 = vld [vmem:[#allocation2 + $0xb4] sm:$0xf] }
  0x63   : > { %303 = vst [vmem:[#allocation2 + $0x188] sm:$0xf] %v247_v61 }
  0x64   : > { %414 = vst [vmem:[#allocation2 + $0x184] sm:$0xf] %v358_v63  ;;  %v251_v63 = vld [vmem:[%s2403_s6 + $0xf4] sm:$0xf] }
  0x65   : > { %v2284_v16 = vld [vmem:[#allocation2 + $0x164] sm:$0xf0]  ;;  %415 = vst [vmem:[#allocation2 + $0x18c] sm:$0xf] %v359_v1  ;;  %v362_v1 = vld [vmem:[%s2403_s6 + $0xd0] sm:$0xf] }
  0x66   : > { %v2046_v25 = vld [vmem:[#allocation2 + $0xc0] sm:$0xf]  ;;  %395 = vst [vmem:[#allocation2 + $0xec] sm:$0xf] %v339_v24 }
  0x67   : > { %v2264_v27 = vld [vmem:[#allocation2 + $0xc4] sm:$0xf0]  ;;  %307 = vst [vmem:[#allocation2 + $0x1a8] sm:$0xf] %v251_v63 }
  0x68   : > { %418 = vst [vmem:[#allocation2 + $0x1a4] sm:$0xf] %v362_v1 }
  0x6b   : > { %914 = vmatmul.bf16.gmra.mxu0 %v1983_v32  ;;  %v2111_v32 = vor.u32 %v2280_v31, %v2110_v30  ;;  %v2259_v30 = vld [vmem:[#allocation2 + $0xa4] sm:$0xf]  ;;  %v2032_v31 = vld [vmem:[#allocation2 + $0xa8] sm:$0xf0] }
  0x6c   : > { %1063 = vmatmul.bf16.gmra.mxu1 %v1987_v33  ;;  %v2279_v33 = vld [vmem:[#allocation2 + $0x144] sm:$0xf]  ;;  %v2035_v37 = vor.u32 %v2259_v30, %v2032_v31  ;;  %v248_v31 = vld [vmem:[%s2403_s6 + $0xe8] sm:$0xf] }
  0x6d   : > { %v2115_v35 = vor.u32 %v2279_v33, %v2112_v34  ;;  %v245_v33 = vld [vmem:[%s2403_s6 + $0xdc] sm:$0xf]  ;;  %v356_v34 = vld [vmem:[%s2403_s6 + $0xb8] sm:$0xf]  ;;  %304 = vst [vmem:[#allocation2 + $0x190] sm:$0xf] %v248_v31 }
  0x6e   : > { %301 = vst [vmem:[#allocation2 + $0x178] sm:$0xf] %v245_v33 }
  0x6f   : > { %412 = vst [vmem:[#allocation2 + $0x174] sm:$0xf] %v356_v34  ;;  %v360_v34 = vld [vmem:[%s2403_s6 + $0xc8] sm:$0xf] }
  0x70   : > { %989 = vmatmul.bf16.gmra.mxu2 %v2103_v12  ;;  %416 = vst [vmem:[#allocation2 + $0x194] sm:$0xf] %v360_v34  ;;  %v2064_v34 = vld [vmem:[#allocation2 + $0xe8] sm:$0xf0] }
  0x72   : > { %1138 = vmatmul.bf16.gmra.mxu3 %v2107_v15  ;;  %v2126_v15 = vld [vmem:[#allocation2 + $0x160] sm:$0xf] }
  0x73   : > { %v2127_v17 = vor.u32 %v2284_v16, %v2126_v15  ;;  %v2287_v15 = vld [vmem:[#allocation2 + $0x184] sm:$0xf]  ;;  %v2144_v16 = vld [vmem:[#allocation2 + $0x188] sm:$0xf0] }
  0x75   : > { %v2286_v42 = vld [vmem:[#allocation2 + $0x174] sm:$0xf0] }
  0x76   : > { %v2285_v44 = vld [vmem:[#allocation2 + $0x174] sm:$0xf] }
  0x7b   : > { %919 = vmatmul.bf16.gmra.mxu0 %v1991_v52 }
  0x7c   : > { %1068 = vmatmul.bf16.gmra.mxu1 %v1995_v53  ;;  %v2118_v53 = vld [vmem:[#allocation2 + $0x150] sm:$0xf] }
  0x7d   : > { %v2119_v55 = vor.u32 %v2282_v54, %v2118_v53  ;;  %v337_v54 = vld [vmem:[%s2403_s6 + $0x6c] sm:$0xf] }
  0x7e   : > { %393 = vst [vmem:[#allocation2 + $0xdc] sm:$0xf] %v337_v54 }
  0x80   : > { %994 = vmatmul.bf16.gmra.mxu2 %v2111_v32  ;;  %v244_v32 = vld [vmem:[%s2403_s6 + $0xd8] sm:$0xf] }
  0x81   : > { %300 = vst [vmem:[#allocation2 + $0x170] sm:$0xf] %v244_v32  ;;  %v249_v32 = vld [vmem:[%s2403_s6 + $0xec] sm:$0xf] }
  0x82   : > { %1143 = vmatmul.bf16.gmra.mxu3 %v2115_v35  ;;  %v357_v35 = vld [vmem:[%s2403_s6 + $0xbc] sm:$0xf]  ;;  %305 = vst [vmem:[#allocation2 + $0x198] sm:$0xf] %v249_v32 }
  0x83   : > { %413 = vst [vmem:[#allocation2 + $0x17c] sm:$0xf] %v357_v35  ;;  %v361_v35 = vld [vmem:[%s2403_s6 + $0xcc] sm:$0xf] }
  0x84   : > { %417 = vst [vmem:[#allocation2 + $0x19c] sm:$0xf] %v361_v35 }
  0x88   : > { %v2134_v41 = vld [vmem:[#allocation2 + $0x170] sm:$0xf] }
  0x89   : > { %v2135_v43 = vor.u32 %v2286_v42, %v2134_v41 }
  0x8a   : > { %v2136_v45 = vld [vmem:[#allocation2 + $0x178] sm:$0xf0] }
  0x8b   : > { %924 = vmatmul.bf16.gmra.mxu0 %v1999_v8  ;;  %v354_v8 = vld [vmem:[%s2403_s6 + $0xb0] sm:$0xf] }
  0x8c   : > { %1073 = vmatmul.bf16.gmra.mxu1 %v2003_v9  ;;  %v355_v9 = vld [vmem:[%s2403_s6 + $0xb4] sm:$0xf]  ;;  %410 = vst [vmem:[#allocation2 + $0x164] sm:$0xf] %v354_v8 }
  0x8d   : > { %411 = vst [vmem:[#allocation2 + $0x16c] sm:$0xf] %v355_v9 }
  0x90   : > { %999 = vmatmul.bf16.gmra.mxu2 %v2119_v55  ;;  %v2038_v55 = vld [vmem:[#allocation2 + $0xb0] sm:$0xf] }
  0x91   : > { %v2039_v2 = vor.u32 %v2262_v56, %v2038_v55 }
  0x92   : > { %1148 = vmatmul.bf16.gmra.mxu3 %v2123_v60  ;;  %v246_v60 = vld [vmem:[%s2403_s6 + $0xe0] sm:$0xf] }
  0x93   : > { %v2283_v18 = vld [vmem:[#allocation2 + $0x164] sm:$0xf]  ;;  %302 = vst [vmem:[#allocation2 + $0x180] sm:$0xf] %v246_v60  ;;  %v2056_v60 = vld [vmem:[#allocation2 + $0xd8] sm:$0xf0] }
  0x94   : > { %v2128_v19 = vld [vmem:[#allocation2 + $0x168] sm:$0xf0] }
  0x95   : > { %v2131_v22 = vor.u32 %v2283_v18, %v2128_v19  ;;  %v2147_v19 = vor.u32 %v2287_v15, %v2144_v16 }
  0x9a   : > { %v2142_v9 = vld [vmem:[#allocation2 + $0x180] sm:$0xf] }
  0x9b   : > { %929 = vmatmul.bf16.gmra.mxu0 %v2007_v28  ;;  %v2030_v28 = vld [vmem:[#allocation2 + $0xa0] sm:$0xf] }
  0x9c   : > { %1078 = vmatmul.bf16.gmra.mxu1 %v2011_v29  ;;  %v2260_v29 = vld [vmem:[#allocation2 + $0xa4] sm:$0xf0] }
  0x9d   : > { %v2031_v36 = vor.u32 %v2260_v29, %v2030_v28  ;;  %v2263_v28 = vld [vmem:[#allocation2 + $0xc4] sm:$0xf]  ;;  %v2048_v29 = vld [vmem:[#allocation2 + $0xc8] sm:$0xf0] }
  0xa0   : > { %1004 = vmatmul.bf16.gmra.mxu2 %v2127_v17 }
  0xa2   : > { %1153 = vmatmul.bf16.gmra.mxu3 %v2131_v22  ;;  %v338_v22 = vld [vmem:[%s2403_s6 + $0x70] sm:$0xf] }
  0xa3   : > { %394 = vst [vmem:[#allocation2 + $0xe4] sm:$0xf] %v338_v22 }
  0xa8   : > { %v895_v50 = vpop.f32.mrf.mxu0 }
  0xa9   : > { %v1044_v51 = vpop.f32.mrf.mxu1 }
  0xaa   : > { %v2507_v52 = vadd.f32 %v1044_v51, %v895_v50  ;;  %v225_v50 = vld [vmem:[%s2403_s6 + $0x8c] sm:$0xf]  ;;  %v336_v51 = vld [vmem:[%s2403_s6 + $0x68] sm:$0xf]  ;;  %v2267_v32 = vld [vmem:[#allocation2 + $0xe4] sm:$0xf] }
  0xab   : > { %934 = vmatmul.bf16.gmra.mxu0 %v2015_v48  ;;  %v2139_v48 = vor.u32 %v2285_v44, %v2136_v45  ;;  %281 = vst [vmem:[#allocation2 + $0xd8] sm:$0xf] %v225_v50  ;;  %v2150_v44 = vld [vmem:[#allocation2 + $0x190] sm:$0xf]  ;;  %v2152_v50 = vld [vmem:[#allocation2 + $0x198] sm:$0xf0] }
  0xac   : > { %1083 = vmatmul.bf16.gmra.mxu1 %v2019_v49  ;;  %v224_v49 = vld [vmem:[%s2403_s6 + $0x88] sm:$0xf]  ;;  %392 = vst [vmem:[#allocation2 + $0xd4] sm:$0xf] %v336_v51 }
  0xad   : > { %280 = vst [vmem:[#allocation2 + $0xd0] sm:$0xf] %v224_v49  ;;  %v2289_v49 = vld [vmem:[#allocation2 + $0x194] sm:$0xf] }
  0xae   : > { %v2155_v55 = vor.u32 %v2289_v49, %v2152_v50 }
  0xb0   : > { %v897_v58 = vpop.f32.mrf.mxu0  ;;  %1009 = vmatmul.bf16.gmra.mxu2 %v2135_v43 }
  0xb1   : > { %v1046_v59 = vpop.f32.mrf.mxu1 }
  0xb2   : > { %v2512_v0 = vadd.f32 %v1046_v59, %v897_v58  ;;  %1158 = vmatmul.bf16.gmra.mxu3 %v2139_v48  ;;  %v2040_v58 = vld [vmem:[#allocation2 + $0xb8] sm:$0xf0] }
  0xb3   : > { %v970_v59 = vpop.f32.mrf.mxu2  ;;  %v2043_v3 = vor.u32 %v2261_v57, %v2040_v58  ;;  %v2266_v58 = vld [vmem:[#allocation2 + $0xd4] sm:$0xf0] }
  0xb4   : > { %v2054_v57 = vld [vmem:[#allocation2 + $0xd0] sm:$0xf] }
  0xb5   : > { %v1119_v62 = vpop.f32.mrf.mxu3 }
  0xb6   : > { %v2543_v4 = vadd.f32 %v1119_v62, %v970_v59  ;;  %v2265_v59 = vld [vmem:[#allocation2 + $0xd4] sm:$0xf]  ;;  %v250_v62 = vld [vmem:[%s2403_s6 + $0xf0] sm:$0xf] }
  0xb7   : > { %306 = vst [vmem:[#allocation2 + $0x1a0] sm:$0xf] %v250_v62 }
  0xb8   : > { %v900_v12 = vpop.f32.mrf.mxu0 }
  0xb9   : > { %v1049_v13 = vpop.f32.mrf.mxu1 }
  0xba   : > { %v2519_v14 = vadd.f32 %v1049_v13, %v900_v12 }
  0xbb   : > { %939 = vmatmul.bf16.gmra.mxu0 %v2023_v10  ;;  %v972_v8 = vpop.f32.mrf.mxu2 }
  0xbc   : > { %3536 = vst [vmem:[#allocation3_spill] sm:$0xff] %v2519_v14  ;;  %1088 = vmatmul.bf16.gmra.mxu1 %v2027_v11  ;;  %v2288_v11 = vld [vmem:[#allocation2 + $0x184] sm:$0xf0] }
  0xbd   : > { %v1121_v10 = vpop.f32.mrf.mxu3  ;;  %v2143_v13 = vor.u32 %v2288_v11, %v2142_v9  ;;  %v1488_v9 = vld [vmem:[%s3509_s3 + $0x70] sm:$0xff] }
  0xbe   : > { %v2547_v12 = vadd.f32 %v1121_v10, %v972_v8  ;;  %v2158_v16 = vld [vmem:[#allocation2 + $0x1a0] sm:$0xf] }
  0xc0   : > { %v902_v20 = vpop.f32.mrf.mxu0  ;;  %1014 = vmatmul.bf16.gmra.mxu2 %v2143_v13 }
  0xc1   : > { %v1051_v21 = vpop.f32.mrf.mxu1 }
  0xc2   : > { %v2524_v26 = vadd.f32 %v1051_v21, %v902_v20  ;;  %v226_v20 = vld [vmem:[%s2403_s6 + $0x90] sm:$0xf]  ;;  %v227_v21 = vld [vmem:[%s2403_s6 + $0x94] sm:$0xf]  ;;  %1163 = vmatmul.bf16.gmra.mxu3 %v2147_v19 }
  0xc3   : > { %282 = vst [vmem:[#allocation2 + $0xe0] sm:$0xf] %v226_v20  ;;  %v2555_v30 = vpop.f32.mrf.mxu2 }
  0xc4   : > { %3537 = vst [vmem:[#allocation4_spill] sm:$0xff] %v2524_v26 }
  0xc5   : > { %283 = vst [vmem:[#allocation2 + $0xe8] sm:$0xf] %v227_v21  ;;  %v2559_v33 = vpop.f32.mrf.mxu3  ;;  %v2291_v21 = vld [vmem:[#allocation2 + $0x1a4] sm:$0xf] }
  0xc8   : > { %v905_v38 = vpop.f32.mrf.mxu0 }
  0xc9   : > { %v1054_v39 = vpop.f32.mrf.mxu1 }
  0xca   : > { %v2531_v40 = vadd.f32 %v1054_v39, %v905_v38  ;;  %v1489_v38 = vld [vmem:[%s3509_s3 + $0x78] sm:$0xff] }
  0xcb   : > { %944 = vmatmul.bf16.gmra.mxu0 %v2031_v36  ;;  %v2047_v36 = vor.u32 %v2264_v27, %v2046_v25  ;;  %1490 = vmatpush.msrb.mxu2 %v1489_v38  ;;  %v977_v43 = vpop.f32.mrf.mxu2 }
  0xcc   : > { %3538 = vst [vmem:[#allocation5_spill] sm:$0xff] %v2531_v40  ;;  %1093 = vmatmul.bf16.gmra.mxu1 %v2035_v37  ;;  %v2051_v37 = vor.u32 %v2263_v28, %v2048_v29  ;;  %1510 = vmatpush.msrb.mxu3 %v1489_v38  ;;  %v2062_v29 = vld [vmem:[#allocation2 + $0xe0] sm:$0xf]  ;;  %v2268_v31 = vld [vmem:[#allocation2 + $0xe4] sm:$0xf0] }
  0xcd   : > { %v1126_v45 = vpop.f32.mrf.mxu3  ;;  %1491 = vmatpush.msrb.mxu2 %v1488_v9  ;;  %v364_v38 = vld [vmem:[%s2403_s6 + $0xd8] sm:$0xf] }
  0xce   : > { %1511 = vmatpush.msrb.mxu3 %v1488_v9  ;;  %420 = vst [vmem:[#allocation2 + $0x1b4] sm:$0xf] %v364_v38  ;;  %v1484_v38 = vld [vmem:[%s3509_s3 + $0x50] sm:$0xff] }
  0xd0   : > { %v907_v46 = vpop.f32.mrf.mxu0 }
  0xd1   : > { %v1056_v47 = vpop.f32.mrf.mxu1 }
  0xd2   : > { %v2536_v53 = vadd.f32 %v1056_v47, %v907_v46  ;;  %v2290_v46 = vld [vmem:[#allocation2 + $0x194] sm:$0xf0]  ;;  %v2568_v47 = vadd.f32 %v1126_v45, %v977_v43  ;;  %1168 = vmatmul.bf16.gmra.mxu3 %v2155_v55  ;;  %v2063_v43 = vor.u32 %v2268_v31, %v2062_v29  ;;  %v1487_v45 = vld [vmem:[%s3509_s3 + $0x68] sm:$0xff] }
  0xd3   : > { %v2151_v48 = vor.u32 %v2290_v46, %v2150_v44  ;;  %v980_v61 = vpop.f32.mrf.mxu2  ;;  %v2067_v44 = vor.u32 %v2267_v32, %v2064_v34  ;;  %1492 = vmatpush.msrb.mxu2 %v1487_v45  ;;  %1512 = vmatpush.msrb.mxu3 %v1487_v45 }
  0xd4   : > { %3539 = vst [vmem:[#allocation6_spill] sm:$0xff] %v2536_v53 }
  0xd5   : > { %3542 = vst [vmem:[#allocation9_spill] sm:$0xff] %v2568_v47  ;;  %1019 = vmatmul.bf16.gmra.mxu2 %v2151_v48 }
  0xd8   : > { %v910_v5 = vpop.f32.mrf.mxu0 }
  0xd9   : > { %v1059_v6 = vpop.f32.mrf.mxu1 }
  0xda   : > { %v2545_v7 = vadd.f32 %v1059_v6, %v910_v5  ;;  %v2055_v5 = vor.u32 %v2266_v58, %v2054_v57  ;;  %v2059_v6 = vor.u32 %v2265_v59, %v2056_v60  ;;  %v2293_v60 = vld [vmem:[#allocation2 + $0x1b4] sm:$0xf] }
  0xdb   : > { %949 = vmatmul.bf16.gmra.mxu0 %v2039_v2  ;;  %v1129_v2 = vpop.f32.mrf.mxu3  ;;  %v982_v15 = vpop.f32.mrf.mxu2 }
  0xdc   : > { %3540 = vst [vmem:[#allocation7_spill] sm:$0xff] %v2545_v7  ;;  %1098 = vmatmul.bf16.gmra.mxu1 %v2043_v3  ;;  %v363_v3 = vld [vmem:[%s2403_s6 + $0xd4] sm:$0xf]  ;;  %v2576_v8 = vadd.f32 %v1129_v2, %v980_v61  ;;  %v1486_v61 = vld [vmem:[%s3509_s3 + $0x60] sm:$0xff] }
  0xdd   : > { %419 = vst [vmem:[#allocation2 + $0x1ac] sm:$0xf] %v363_v3  ;;  %1493 = vmatpush.msrb.mxu2 %v1486_v61  ;;  %1513 = vmatpush.msrb.mxu3 %v1486_v61 }
  0xe0   : > { %v912_v17 = vpop.f32.mrf.mxu0 }
  0xe1   : > { %v1061_v18 = vpop.f32.mrf.mxu1 }
  0xe2   : > { %v2552_v23 = vadd.f32 %v1061_v18, %v912_v17  ;;  %v2292_v18 = vld [vmem:[#allocation2 + $0x1a4] sm:$0xf0] }
  0xe3   : > { %v1131_v17 = vpop.f32.mrf.mxu3  ;;  %v2159_v20 = vor.u32 %v2292_v18, %v2158_v16  ;;  %v985_v35 = vpop.f32.mrf.mxu2 }
  0xe4   : > { %v2583_v19 = vadd.f32 %v1131_v17, %v982_v15  ;;  %v2160_v22 = vld [vmem:[#allocation2 + $0x1a8] sm:$0xf0] }
  0xe5   : > { %1024 = vmatmul.bf16.gmra.mxu2 %v2159_v20  ;;  %v2163_v27 = vor.u32 %v2291_v21, %v2160_v22  ;;  %v1485_v20 = vld [vmem:[%s3509_s3 + $0x58] sm:$0xff] }
  0xe6   : > { %1494 = vmatpush.msrb.mxu2 %v1485_v20  ;;  %1514 = vmatpush.msrb.mxu3 %v1485_v20  ;;  %v1185_v20 = vld [vmem:[%s3508_s2 + $0x8] sm:$0xff] }
  0xe7   : > { %1173 = vmatmul.bf16.gmra.mxu3 %v2163_v27 }
  0xe8   : > { %v915_v39 = vpop.f32.mrf.mxu0  ;;  %1495 = vmatpush.msrb.mxu2 %v1484_v38  ;;  %1515 = vmatpush.msrb.mxu3 %v1484_v38  ;;  %v1188_v38 = vld [vmem:[%s3508_s2 + $0x20] sm:$0xff] }
  0xe9   : > { %v1064_v41 = vpop.f32.mrf.mxu1 }
  0xea   : > { %v2566_v42 = vadd.f32 %v1064_v41, %v915_v39  ;;  %v365_v41 = vld [vmem:[%s2403_s6 + $0xdc] sm:$0xf] }
  0xeb   : > { %954 = vmatmul.bf16.gmra.mxu0 %v2047_v36  ;;  %v252_v36 = vld [vmem:[%s2403_s6 + $0xf8] sm:$0xf]  ;;  %v1134_v39 = vpop.f32.mrf.mxu3  ;;  %421 = vst [vmem:[#allocation2 + $0x1bc] sm:$0xf] %v365_v41 }
  0xec   : > { %3541 = vst [vmem:[#allocation8_spill] sm:$0xff] %v2566_v42  ;;  %1103 = vmatmul.bf16.gmra.mxu1 %v2051_v37  ;;  %v253_v37 = vld [vmem:[%s2403_s6 + $0xfc] sm:$0xf]  ;;  %v2594_v46 = vadd.f32 %v1134_v39, %v985_v35 }
  0xed   : > { %308 = vst [vmem:[#allocation2 + $0x1b0] sm:$0xf] %v252_v36 }
  0xee   : > { %309 = vst [vmem:[#allocation2 + $0x1b8] sm:$0xf] %v253_v37 }
  0xf0   : > { %v917_v51 = vpop.f32.mrf.mxu0 }
  0xf1   : > { %v1066_v54 = vpop.f32.mrf.mxu1 }
  0xf2   : > { %v2570_v56 = vadd.f32 %v1066_v54, %v917_v51  ;;  %v987_v51 = vpop.f32.mrf.mxu2  ;;  %v2168_v62 = vld [vmem:[#allocation2 + $0x1b8] sm:$0xf0] }
  0xf3   : > { %v1136_v55 = vpop.f32.mrf.mxu3  ;;  %v2171_v2 = vor.u32 %v2293_v60, %v2168_v62 }
  0xf4   : > { %3543 = vst [vmem:[#allocation10_spill] sm:$0xff] %v2570_v56  ;;  %v2166_v54 = vld [vmem:[#allocation2 + $0x1b0] sm:$0xf]  ;;  %v2598_v58 = vadd.f32 %v1136_v55, %v987_v51 }
  0xf5   : > { %v2294_v57 = vld [vmem:[#allocation2 + $0x1b4] sm:$0xf0] }
  0xf6   : > { %3547 = vst [vmem:[#allocation14_spill] sm:$0xff] %v2598_v58  ;;  %v2167_v59 = vor.u32 %v2294_v57, %v2166_v54 }
  0xf7   : > { %1178 = vmatmul.bf16.gmra.mxu3 %v2171_v2 }
  0xf8   : > { %v920_v10 = vpop.f32.mrf.mxu0  ;;  %1029 = vmatmul.bf16.gmra.mxu2 %v2167_v59 }
  0xf9   : > { %v1069_v11 = vpop.f32.mrf.mxu1 }
  0xfa   : > { %v2581_v13 = vadd.f32 %v1069_v11, %v920_v10 }
  0xfb   : > { %959 = vmatmul.bf16.gmra.mxu0 %v2055_v5  ;;  %v990_v5 = vpop.f32.mrf.mxu2 }
  0xfc   : > { %3544 = vst [vmem:[#allocation11_spill] sm:$0xff] %v2581_v13  ;;  %1108 = vmatmul.bf16.gmra.mxu1 %v2059_v6  ;;  %v1139_v6 = vpop.f32.mrf.mxu3 }
  0xfd   : > { %v2605_v9 = vadd.f32 %v1139_v6, %v990_v5  ;;  %v1482_v5 = vld [vmem:[%s3509_s3 + $0x40] sm:$0xff] }
  0xff   : > { %3548 = vst [vmem:[#allocation15_spill] sm:$0xff] %v2605_v9 }
 0x100   : > { %v922_v24 = vpop.f32.mrf.mxu0 }
 0x101   : > { %v1071_v25 = vpop.f32.mrf.mxu1 }
 0x102   : > { %v2585_v28 = vadd.f32 %v1071_v25, %v922_v24 }
 0x103   : > { %v992_v16 = vpop.f32.mrf.mxu2 }
 0x104   : > { %3545 = vst [vmem:[#allocation12_spill] sm:$0xff] %v2585_v28  ;;  %v1141_v17 = vpop.f32.mrf.mxu3 }
 0x105   : > { %v2609_v18 = vadd.f32 %v1141_v17, %v992_v16 }
 0x107   : > { %3549 = vst [vmem:[#allocation16_spill] sm:$0xff] %v2609_v18 }
 0x108   : > { %v925_v48 = vpop.f32.mrf.mxu0 }
 0x109   : > { %v1074_v49 = vpop.f32.mrf.mxu1 }
 0x10a   : > { %v2596_v50 = vadd.f32 %v1074_v49, %v925_v48  ;;  %v1483_v49 = vld [vmem:[%s3509_s3 + $0x48] sm:$0xff] }
 0x10b   : > { %964 = vmatmul.bf16.gmra.mxu0 %v2063_v43  ;;  %v995_v25 = vpop.f32.mrf.mxu2  ;;  %1496 = vmatpush.msrb.mxu2 %v1483_v49 }
 0x10c   : > { %3546 = vst [vmem:[#allocation13_spill] sm:$0xff] %v2596_v50  ;;  %1113 = vmatmul.bf16.gmra.mxu1 %v2067_v44  ;;  %v1144_v27 = vpop.f32.mrf.mxu3  ;;  %1516 = vmatpush.msrb.mxu3 %v1483_v49  ;;  %v1189_v49 = vld [vmem:[%s3508_s2 + $0x28] sm:$0xff] }
 0x10d   : > { %v2616_v29 = vadd.f32 %v1144_v27, %v995_v25  ;;  %1497 = vmatpush.msrb.mxu2 %v1482_v5  ;;  %v1241_v25 = vmul.f32 %v1185_v20, %v2512_v0  ;;  %v1187_v27 = vld [vmem:[%s3508_s2 + $0x18] sm:$0xff] }
 0x10e   : > { %1517 = vmatpush.msrb.mxu3 %v1482_v5 }
 0x10f   : > { %3551 = vst [vmem:[#allocation18_spill] sm:$0xff] %v2616_v29 }
 0x110   : > { %v927_v63 = vpop.f32.mrf.mxu0 }
 0x111   : > { %v1076_v1 = vpop.f32.mrf.mxu1 }
 0x112   : > { %v2603_v3 = vadd.f32 %v1076_v1, %v927_v63 }
 0x113   : > { %v997_v35 = vpop.f32.mrf.mxu2 }
 0x114   : > { %v1146_v36 = vpop.f32.mrf.mxu3 }
 0x115   : > { %v2620_v37 = vadd.f32 %v1146_v36, %v997_v35 }
 0x118   : > { %v930_v10 = vpop.f32.mrf.mxu0 }
 0x119   : > { %v1079_v11 = vpop.f32.mrf.mxu1 }
 0x11a   : > { %v2607_v15 = vadd.f32 %v1079_v11, %v930_v10  ;;  %v1481_v11 = vld [vmem:[%s3509_s3 + $0x38] sm:$0xff] }
 0x11b   : > { %v1000_v44 = vpop.f32.mrf.mxu2  ;;  %1498 = vmatpush.msrb.mxu2 %v1481_v11  ;;  %1518 = vmatpush.msrb.mxu3 %v1481_v11  ;;  %v1245_v11 = vmul.f32 %v1189_v49, %v2536_v53  ;;  %v1192_v49 = vld [vmem:[%s3508_s2 + $0x40] sm:$0xff] }
 0x11c   : > { %v1149_v45 = vpop.f32.mrf.mxu3 }
 0x11d   : > { %v2627_v48 = vadd.f32 %v1149_v45, %v1000_v44  ;;  %v1358_v44 = vmul.f32 %v1241_v25, %v2512_v0  ;;  %v1243_v45 = vmul.f32 %v1187_v27, %v2524_v26 }
 0x11f   : > { %v1360_v5 = vmul.f32 %v1243_v45, %v2524_v26 }
 0x120   : > { %v932_v21 = vpop.f32.mrf.mxu0 }
 0x121   : > { %v1081_v22 = vpop.f32.mrf.mxu1 }
 0x122   : > { %v2614_v24 = vadd.f32 %v1081_v22, %v932_v21  ;;  %v1184_v21 = vld [vmem:[%s3508_s2] sm:$0xff]  ;;  %v1186_v22 = vld [vmem:[%s3508_s2 + $0x10] sm:$0xff] }
 0x123   : > { %v1002_v57 = vpop.f32.mrf.mxu2 }
 0x124   : > { %3550 = vst [vmem:[#allocation17_spill] sm:$0xff] %v2614_v24  ;;  %v1151_v59 = vpop.f32.mrf.mxu3 }
 0x125   : > { %v2634_v60 = vadd.f32 %v1151_v59, %v1002_v57  ;;  %v1244_v57 = vmul.f32 %v1188_v38, %v2531_v40 }
 0x128   : > { %v935_v31 = vpop.f32.mrf.mxu0 }
 0x129   : > { %v1084_v32 = vpop.f32.mrf.mxu1 }
 0x12a   : > { %v2618_v34 = vadd.f32 %v1084_v32, %v935_v31  ;;  %v1240_v31 = vmul.f32 %v1184_v21, %v2507_v52  ;;  %v1242_v32 = vmul.f32 %v1186_v22, %v2519_v14  ;;  %v1191_v21 = vld [vmem:[%s3508_s2 + $0x38] sm:$0xff]  ;;  %v1480_v22 = vld [vmem:[%s3509_s3 + $0x30] sm:$0xff] }
 0x12b   : > { %v1005_v63 = vpop.f32.mrf.mxu2  ;;  %1499 = vmatpush.msrb.mxu2 %v1480_v22  ;;  %1519 = vmatpush.msrb.mxu3 %v1480_v22 }
 0x12c   : > { %v1154_v1 = vpop.f32.mrf.mxu3  ;;  %v1296_v59 = vadd.f32 %v1241_v25, %v1240_v31  ;;  %v1361_v25 = vmul.f32 %v1244_v57, %v2531_v40 }
 0x12d   : > { %v2640_v2 = vadd.f32 %v1154_v1, %v1005_v63  ;;  %v1190_v63 = vld [vmem:[%s3508_s2 + $0x30] sm:$0xff] }
 0x12e   : > { %v1297_v20 = vadd.f32 %v1296_v59, %v1242_v32  ;;  %v1362_v59 = vmul.f32 %v1245_v11, %v2536_v53  ;;  %v1195_v53 = vld [vmem:[%s3508_s2 + $0x58] sm:$0xff] }
 0x130   : > { %v937_v39 = vpop.f32.mrf.mxu0 }
 0x131   : > { %v1086_v41 = vpop.f32.mrf.mxu1 }
 0x132   : > { %v2625_v43 = vadd.f32 %v1086_v41, %v937_v39 }
 0x133   : > { %v2678_v39 = vpop.f32.mrf.mxu2 }
 0x134   : > { %v2680_v41 = vpop.f32.mrf.mxu3 }
 0x138   : > { %v940_v51 = vpop.f32.mrf.mxu0 }
 0x139   : > { %v1089_v54 = vpop.f32.mrf.mxu1 }
 0x13a   : > { %v2632_v55 = vadd.f32 %v1089_v54, %v940_v51  ;;  %v1357_v51 = vmul.f32 %v1240_v31, %v2507_v52  ;;  %v1359_v54 = vmul.f32 %v1242_v32, %v2519_v14  ;;  %v1246_v31 = vmul.f32 %v1190_v63, %v2545_v7  ;;  %v1193_v63 = vld [vmem:[%s3508_s2 + $0x48] sm:$0xff] }
 0x13b   : > { %v1298_v32 = vadd.f32 %v1297_v20, %v1243_v45  ;;  %v2715_v40 = vpop.f32.mrf.mxu2  ;;  %v1248_v20 = vmul.f32 %v1192_v49, %v2566_v42 }
 0x13c   : > { %v1413_v1 = vadd.f32 %v1358_v44, %v1357_v51  ;;  %v2717_v26 = vpop.f32.mrf.mxu3  ;;  %v1363_v45 = vmul.f32 %v1246_v31, %v2545_v7 }
 0x13e   : > { %v1414_v27 = vadd.f32 %v1413_v1, %v1359_v54  ;;  %v1247_v54 = vmul.f32 %v1191_v21, %v2552_v23  ;;  %v1299_v1 = vadd.f32 %v1298_v32, %v1244_v57 }
 0x140   : > { %v2636_v61 = vpop.f32.mrf.mxu0  ;;  %v1415_v51 = vadd.f32 %v1414_v27, %v1360_v5  ;;  %v1300_v14 = vadd.f32 %v1299_v1, %v1245_v11  ;;  %v1194_v5 = vld [vmem:[%s3508_s2 + $0x50] sm:$0xff]  ;;  %v1364_v57 = vmul.f32 %v1247_v54, %v2552_v23  ;;  %v1249_v27 = vmul.f32 %v1193_v63, %v2570_v56 }
 0x141   : > { %v2638_v62 = vpop.f32.mrf.mxu1  ;;  %v1250_v49 = vmul.f32 %v1194_v5, %v2581_v13 }
 0x142   : > { %v1416_v22 = vadd.f32 %v1415_v51, %v1361_v25  ;;  %v1301_v32 = vadd.f32 %v1300_v14, %v1246_v31  ;;  %v1365_v51 = vmul.f32 %v1248_v20, %v2566_v42  ;;  %v1366_v14 = vmul.f32 %v1249_v27, %v2570_v56 }
 0x143   : > { %v1251_v31 = vmul.f32 %v1195_v53, %v2585_v28 }
 0x144   : > { %v1417_v21 = vadd.f32 %v1416_v22, %v1362_v59  ;;  %v1302_v7 = vadd.f32 %v1301_v32, %v1247_v54  ;;  %v1196_v59 = vld [vmem:[%s3508_s2 + $0x60] sm:$0xff]  ;;  %v1198_v32 = vld [vmem:[%s3508_s2 + $0x70] sm:$0xff] }
 0x145   : > { %v1252_v42 = vmul.f32 %v1196_v59, %v2596_v50 }
 0x146   : > { %v1418_v25 = vadd.f32 %v1417_v21, %v1363_v45  ;;  %v1303_v22 = vadd.f32 %v1302_v7, %v1248_v20  ;;  %v1197_v45 = vld [vmem:[%s3508_s2 + $0x68] sm:$0xff]  ;;  %v1367_v21 = vmul.f32 %v1250_v49, %v2581_v13  ;;  %v1368_v7 = vmul.f32 %v1251_v31, %v2585_v28 }
 0x147   : > { %v1253_v20 = vmul.f32 %v1197_v45, %v2603_v3  ;;  %v1200_v45 = vld [vmem:[%s3508_s2 + $0x80] sm:$0xff] }
 0x148   : > { %v2645_v6 = vpop.f32.mrf.mxu0  ;;  %v1419_v63 = vadd.f32 %v1418_v25, %v1364_v57  ;;  %v1304_v54 = vadd.f32 %v1303_v22, %v1249_v27  ;;  %v2748_v57 = vpop.f32.mrf.mxu2  ;;  %v1479_v27 = vld [vmem:[%s3509_s3 + $0x28] sm:$0xff]  ;;  %v1254_v22 = vmul.f32 %v1198_v32, %v2607_v15 }
 0x149   : > { %v2647_v10 = vpop.f32.mrf.mxu1  ;;  %v2750_v25 = vpop.f32.mrf.mxu3  ;;  %1500 = vmatpush.msrb.mxu2 %v1479_v27  ;;  %1520 = vmatpush.msrb.mxu3 %v1479_v27  ;;  %v1201_v32 = vld [vmem:[%s3508_s2 + $0x88] sm:$0xff]  ;;  %v1256_v27 = vmul.f32 %v1200_v45, %v2618_v34 }
 0x14a   : > { %v1420_v5 = vadd.f32 %v1419_v63, %v1365_v51  ;;  %v1305_v56 = vadd.f32 %v1304_v54, %v1250_v49  ;;  %v1199_v51 = vld [vmem:[%s3508_s2 + $0x78] sm:$0xff]  ;;  %v1369_v63 = vmul.f32 %v1252_v42, %v2596_v50  ;;  %v1370_v54 = vmul.f32 %v1253_v20, %v2603_v3 }
 0x14b   : > { %v1371_v28 = vmul.f32 %v1254_v22, %v2607_v15 }
 0x14c   : > { %v1421_v53 = vadd.f32 %v1420_v5, %v1366_v14  ;;  %v1306_v49 = vadd.f32 %v1305_v56, %v1251_v31  ;;  %v1202_v31 = vld [vmem:[%s3508_s2 + $0x90] sm:$0xff] }
 0x14e   : > { %v1422_v59 = vadd.f32 %v1421_v53, %v1367_v21  ;;  %v1255_v21 = vmul.f32 %v1199_v51, %v2614_v24  ;;  %v1307_v53 = vadd.f32 %v1306_v49, %v1252_v42  ;;  %v1257_v51 = vmul.f32 %v1201_v32, %v2625_v43  ;;  %v1204_v32 = vld [vmem:[%s3508_s2 + $0xa0] sm:$0xff] }
 0x14f   : > { %v2783_v42 = vadd.f32 %v2638_v62, %v2636_v61 }
 0x150   : > { %v2652_v16 = vpop.f32.mrf.mxu0  ;;  %v1423_v5 = vadd.f32 %v1422_v59, %v1368_v7  ;;  %v1308_v56 = vadd.f32 %v1307_v53, %v1253_v20  ;;  %v1372_v59 = vmul.f32 %v1255_v21, %v2614_v24  ;;  %v2788_v45 = vpop.f32.mrf.mxu2  ;;  %v2796_v53 = vadd.f32 %v2647_v10, %v2645_v6  ;;  %v1205_v6 = vld [vmem:[%s3508_s2 + $0xa8] sm:$0xff] }
 0x151   : > { %v2654_v17 = vpop.f32.mrf.mxu1  ;;  %v2790_v20 = vpop.f32.mrf.mxu3  ;;  %v1374_v24 = vmul.f32 %v1257_v51, %v2625_v43 }
 0x152   : > { %v1424_v50 = vadd.f32 %v1423_v5, %v1369_v63  ;;  %v1309_v49 = vadd.f32 %v1308_v56, %v1254_v22  ;;  %v1203_v63 = vld [vmem:[%s3508_s2 + $0x98] sm:$0xff] }
 0x154   : > { %v1425_v7 = vadd.f32 %v1424_v50, %v1370_v54  ;;  %v1373_v50 = vmul.f32 %v1256_v27, %v2618_v34  ;;  %v1258_v54 = vmul.f32 %v1202_v31, %v2632_v55  ;;  %v1310_v22 = vadd.f32 %v1309_v49, %v1255_v21 }
 0x155   : > { %v1260_v49 = vmul.f32 %v1204_v32, %v2796_v53 }
 0x156   : > { %v1426_v5 = vadd.f32 %v1425_v7, %v1371_v28  ;;  %v1259_v28 = vmul.f32 %v1203_v63, %v2783_v42  ;;  %v2805_v7 = vadd.f32 %v2654_v17, %v2652_v16  ;;  %v1311_v31 = vadd.f32 %v1310_v22, %v1256_v27  ;;  %v1206_v16 = vld [vmem:[%s3508_s2 + $0xb0] sm:$0xff] }
 0x157   : > { %v1375_v21 = vmul.f32 %v1258_v54, %v2632_v55 }
 0x158   : > { %v2671_v35 = vpop.f32.mrf.mxu0  ;;  %v1427_v56 = vadd.f32 %v1426_v5, %v1372_v59  ;;  %3552 = vst [vmem:[#allocation19_spill] sm:$0xff] %v2805_v7  ;;  %v1312_v5 = vadd.f32 %v1311_v31, %v1257_v51  ;;  %v1376_v27 = vmul.f32 %v1259_v28, %v2783_v42  ;;  %v1261_v63 = vmul.f32 %v1205_v6, %v2805_v7 }
 0x159   : > { %v2673_v36 = vpop.f32.mrf.mxu1 }
 0x15a   : > { %v1428_v10 = vadd.f32 %v1427_v56, %v1373_v50  ;;  %v2814_v59 = vadd.f32 %v2673_v36, %v2671_v35  ;;  %v1313_v22 = vadd.f32 %v1312_v5, %v1258_v54  ;;  %v1377_v56 = vmul.f32 %v1260_v49, %v2796_v53  ;;  %v1207_v36 = vld [vmem:[%s3508_s2 + $0xb8] sm:$0xff] }
 0x15c   : > { %v1429_v17 = vadd.f32 %v1428_v10, %v1374_v24  ;;  %v1262_v35 = vmul.f32 %v1206_v16, %v2814_v59  ;;  %v1314_v31 = vadd.f32 %v1313_v22, %v1259_v28  ;;  %v2838_v10 = vpop.f32.mrf.mxu2 }
 0x15e   : > { %v1430_v32 = vadd.f32 %v1429_v17, %v1375_v21  ;;  %v2840_v21 = vpop.f32.mrf.mxu3  ;;  %v1315_v5 = vadd.f32 %v1314_v31, %v1260_v49  ;;  %v1209_v17 = vld [vmem:[%s3508_s2 + $0xc8] sm:$0xff]  ;;  %v1210_v49 = vld [vmem:[%s3508_s2 + $0xd0] sm:$0xff] }
 0x160   : > { %v2703_v38 = vpop.f32.mrf.mxu0  ;;  %v1431_v54 = vadd.f32 %v1430_v32, %v1376_v27  ;;  %v1316_v27 = vadd.f32 %v1315_v5, %v1261_v63 }
 0x161   : > { %v2705_v44 = vpop.f32.mrf.mxu1 }
 0x162   : > { %v2823_v50 = vadd.f32 %v2705_v44, %v2703_v38  ;;  %v1378_v38 = vmul.f32 %v1261_v63, %v2805_v7  ;;  %v1208_v44 = vld [vmem:[%s3508_s2 + $0xc0] sm:$0xff]  ;;  %v1211_v63 = vld [vmem:[%s3508_s2 + $0xd8] sm:$0xff] }
 0x164   : > { %v1263_v16 = vmul.f32 %v1207_v36, %v2823_v50  ;;  %v1317_v36 = vadd.f32 %v1316_v27, %v1262_v35 }
 0x168   : > { %v2731_v11 = vpop.f32.mrf.mxu0 }
 0x169   : > { %v2733_v1 = vpop.f32.mrf.mxu1 }
 0x16a   : > { %v2832_v6 = vadd.f32 %v2733_v1, %v2731_v11  ;;  %v1432_v11 = vadd.f32 %v1431_v54, %v1377_v56  ;;  %v1379_v1 = vmul.f32 %v1262_v35, %v2814_v59  ;;  %v1212_v35 = vld [vmem:[%s3508_s2 + $0xe0] sm:$0xff] }
 0x16c   : > { %v1264_v22 = vmul.f32 %v1208_v44, %v2832_v6  ;;  %v1433_v7 = vadd.f32 %v1432_v11, %v1378_v38 }
 0x16e   : > { %v1434_v31 = vadd.f32 %v1433_v7, %v1379_v1  ;;  %v1381_v38 = vmul.f32 %v1264_v22, %v2832_v6  ;;  %v2873_v1 = vpop.f32.mrf.mxu2 }
 0x170   : > { %v2762_v13 = vpop.f32.mrf.mxu0 }
 0x171   : > { %v2764_v14 = vpop.f32.mrf.mxu1 }
 0x172   : > { %v2845_v28 = vadd.f32 %v2764_v14, %v2762_v13  ;;  %v1380_v13 = vmul.f32 %v1263_v16, %v2823_v50 }
 0x174   : > { %v1265_v14 = vmul.f32 %v1209_v17, %v2845_v28  ;;  %v2875_v17 = vpop.f32.mrf.mxu3 }
 0x176   : > { %v1382_v7 = vmul.f32 %v1265_v14, %v2845_v28 }
 0x178   : > { %v960_v61 = vpop.f32.mrf.mxu0 }
 0x179   : > { %v1109_v62 = vpop.f32.mrf.mxu1 }
 0x17a   : > { %v2852_v32 = vadd.f32 %v1109_v62, %v960_v61  ;;  %v1318_v62 = vadd.f32 %v1317_v36, %v1263_v16 }
 0x17c   : > { %v1266_v44 = vmul.f32 %v1210_v49, %v2852_v32 }
 0x17e   : > { %v1383_v49 = vmul.f32 %v1266_v44, %v2852_v32 }
 0x180   : > { %v962_v51 = vpop.f32.mrf.mxu0 }
 0x181   : > { %v1111_v24 = vpop.f32.mrf.mxu1 }
 0x182   : > { %v2859_v56 = vadd.f32 %v1111_v24, %v962_v51  ;;  %v1435_v51 = vadd.f32 %v1434_v31, %v1380_v13  ;;  %v1319_v24 = vadd.f32 %v1318_v62, %v1264_v22  ;;  %v1213_v62 = vld [vmem:[%s3508_s2 + $0xe8] sm:$0xff] }
 0x184   : > { %3553 = vst [vmem:[#allocation20_spill] sm:$0xff] %v2859_v56  ;;  %v1267_v11 = vmul.f32 %v1211_v63, %v2859_v56  ;;  %v1436_v16 = vadd.f32 %v1435_v51, %v1381_v38  ;;  %v1320_v27 = vadd.f32 %v1319_v24, %v1265_v14 }
 0x186   : > { %v1437_v13 = vadd.f32 %v1436_v16, %v1382_v7  ;;  %v1321_v22 = vadd.f32 %v1320_v27, %v1266_v44  ;;  %v1384_v31 = vmul.f32 %v1267_v11, %v2859_v56  ;;  %v1215_v44 = vld [vmem:[%s3508_s2 + $0xf8] sm:$0xff]  ;;  %v2895_v7 = vadd.f32 %v2559_v33, %v2555_v30  ;;  %v2906_v30 = vpop.f32.mrf.mxu2  ;;  %v2908_v33 = vpop.f32.mrf.mxu3 }
 0x188   : > { %v965_v54 = vpop.f32.mrf.mxu0  ;;  %v1438_v38 = vadd.f32 %v1437_v13, %v1383_v49  ;;  %v1322_v14 = vadd.f32 %v1321_v22, %v1267_v11  ;;  %v1216_v11 = vld [vmem:[%s3508_s2 + $0x100] sm:$0xff]  ;;  %v1271_v49 = vmul.f32 %v1215_v44, %v2547_v12 }
 0x189   : > { %v1114_v61 = vpop.f32.mrf.mxu1 }
 0x18a   : > { %v2866_v5 = vadd.f32 %v1114_v61, %v965_v54  ;;  %v1214_v54 = vld [vmem:[%s3508_s2 + $0xf0] sm:$0xff]  ;;  %v1439_v16 = vadd.f32 %v1438_v38, %v1384_v31  ;;  %v1272_v31 = vmul.f32 %v1216_v11, %v2895_v7 }
 0x18b   : > { %v1218_v38 = vld [vmem:[%s3508_s2 + $0x110] sm:$0xff] }
 0x18c   : > { %v1268_v36 = vmul.f32 %v1212_v35, %v2866_v5  ;;  %v1270_v35 = vmul.f32 %v1214_v54, %v2543_v4  ;;  %v1274_v11 = vmul.f32 %v1218_v38, %v2576_v8 }
 0x18e   : > { %v1385_v51 = vmul.f32 %v1268_v36, %v2866_v5  ;;  %v1323_v27 = vadd.f32 %v1322_v14, %v1268_v36  ;;  %v1387_v36 = vmul.f32 %v1270_v35, %v2543_v4 }
 0x190   : > { %v967_v61 = vpop.f32.mrf.mxu0  ;;  %v1440_v13 = vadd.f32 %v1439_v16, %v1385_v51  ;;  %v1219_v16 = vld [vmem:[%s3508_s2 + $0x118] sm:$0xff] }
 0x191   : > { %v1116_v63 = vpop.f32.mrf.mxu1 }
 0x192   : > { %v2887_v24 = vadd.f32 %v1116_v63, %v967_v61  ;;  %v1217_v61 = vld [vmem:[%s3508_s2 + $0x108] sm:$0xff] }
 0x193   : > { %v1273_v14 = vmul.f32 %v1217_v61, %v2568_v47  ;;  %v1275_v61 = vmul.f32 %v1219_v16, %v2583_v19 }
 0x194   : > { %v1269_v56 = vmul.f32 %v1213_v62, %v2887_v24 }
 0x196   : > { %v1324_v54 = vadd.f32 %v1323_v27, %v1269_v56  ;;  %v1386_v22 = vmul.f32 %v1269_v56, %v2887_v24  ;;  %v1388_v56 = vmul.f32 %v1271_v49, %v2547_v12  ;;  %v1389_v27 = vmul.f32 %v1272_v31, %v2895_v7 }
 0x198   : > { %v1325_v63 = vadd.f32 %v1324_v54, %v1270_v35  ;;  %v1441_v62 = vadd.f32 %v1440_v13, %v1386_v22  ;;  %v1220_v54 = vld [vmem:[%s3508_s2 + $0x120] sm:$0xff]  ;;  %v1390_v22 = vmul.f32 %v1273_v14, %v2568_v47  ;;  %v2937_v47 = vpop.f32.mrf.mxu3 }
 0x199   : > { %v1276_v38 = vmul.f32 %v1220_v54, %v2594_v46 }
 0x19a   : > { %v1326_v51 = vadd.f32 %v1325_v63, %v1271_v49  ;;  %v1442_v44 = vadd.f32 %v1441_v62, %v1387_v36  ;;  %v1221_v63 = vld [vmem:[%s3508_s2 + $0x128] sm:$0xff]  ;;  %v1391_v62 = vmul.f32 %v1274_v11, %v2576_v8 }
 0x19b   : > { %v1277_v16 = vmul.f32 %v1221_v63, %v2598_v58  ;;  %v1393_v54 = vmul.f32 %v1276_v38, %v2594_v46 }
 0x19c   : > { %v1327_v35 = vadd.f32 %v1326_v51, %v1272_v31  ;;  %v1443_v13 = vadd.f32 %v1442_v44, %v1388_v56  ;;  %v1222_v51 = vld [vmem:[%s3508_s2 + $0x130] sm:$0xff]  ;;  %v2935_v44 = vpop.f32.mrf.mxu2 }
 0x19d   : > { %v1394_v63 = vmul.f32 %v1277_v16, %v2598_v58 }
 0x19e   : > { %v1328_v49 = vadd.f32 %v1327_v35, %v1273_v14  ;;  %v1444_v36 = vadd.f32 %v1443_v13, %v1389_v27  ;;  %v1392_v14 = vmul.f32 %v1275_v61, %v2583_v19  ;;  %v1478_v13 = vld [vmem:[%s3509_s3 + $0x20] sm:$0xff] }
 0x19f   : > { %1501 = vmatpush.msrb.mxu2 %v1478_v13  ;;  %1521 = vmatpush.msrb.mxu3 %v1478_v13  ;;  %v1477_v13 = vld [vmem:[%s3509_s3 + $0x18] sm:$0xff] }
 0x1a0   : > { %v1329_v31 = vadd.f32 %v1328_v49, %v1274_v11  ;;  %v1445_v56 = vadd.f32 %v1444_v36, %v1390_v22  ;;  %v1223_v11 = vld [vmem:[%s3508_s2 + $0x138] sm:$0xff]  ;;  %v1278_v22 = vmul.f32 %v1222_v51, %v2605_v9  ;;  %v1225_v51 = vld [vmem:[%s3508_s2 + $0x148] sm:$0xff] }
 0x1a1   : > { %1502 = vmatpush.msrb.mxu2 %v1477_v13  ;;  %1522 = vmatpush.msrb.mxu3 %v1477_v13 }
 0x1a2   : > { %v1330_v27 = vadd.f32 %v1329_v31, %v1275_v61  ;;  %v1446_v35 = vadd.f32 %v1445_v56, %v1391_v62  ;;  %v1224_v61 = vld [vmem:[%s3508_s2 + $0x140] sm:$0xff]  ;;  %v1279_v62 = vmul.f32 %v1223_v11, %v2609_v18  ;;  %v1226_v11 = vld [vmem:[%s3508_s2 + $0x150] sm:$0xff] }
 0x1a4   : > { %v1331_v49 = vadd.f32 %v1330_v27, %v1276_v38  ;;  %v1447_v36 = vadd.f32 %v1446_v35, %v1392_v14  ;;  %v1395_v38 = vmul.f32 %v1278_v22, %v2605_v9  ;;  %v1280_v14 = vmul.f32 %v1224_v61, %v2616_v29  ;;  %v2973_v61 = vpop.f32.mrf.mxu2 }
 0x1a6   : > { %v1332_v31 = vadd.f32 %v1331_v49, %v1277_v16  ;;  %v1448_v56 = vadd.f32 %v1447_v36, %v1393_v54  ;;  %v1476_v16 = vld [vmem:[%s3509_s3 + $0x10] sm:$0xff]  ;;  %v1396_v54 = vmul.f32 %v1279_v62, %v2609_v18  ;;  %v1281_v49 = vmul.f32 %v1225_v51, %v2620_v37 }
 0x1a7   : > { %1503 = vmatpush.msrb.mxu2 %v1476_v16  ;;  %1523 = vmatpush.msrb.mxu3 %v1476_v16  ;;  %v1228_v16 = vld [vmem:[%s3508_s2 + $0x160] sm:$0xff] }
 0x1a8   : > { %v1333_v27 = vadd.f32 %v1332_v31, %v1278_v22  ;;  %v1449_v35 = vadd.f32 %v1448_v56, %v1394_v63  ;;  %v1227_v22 = vld [vmem:[%s3508_s2 + $0x158] sm:$0xff]  ;;  %v2975_v63 = vpop.f32.mrf.mxu3  ;;  %v1397_v31 = vmul.f32 %v1280_v14, %v2616_v29  ;;  %v1282_v56 = vmul.f32 %v1226_v11, %v2627_v48 }
 0x1a9   : > { %v1284_v9 = vmul.f32 %v1228_v16, %v2640_v2 }
 0x1aa   : > { %v1334_v36 = vadd.f32 %v1333_v27, %v1279_v62  ;;  %v1450_v13 = vadd.f32 %v1449_v35, %v1395_v38  ;;  %v2984_v62 = vadd.f32 %v2680_v41, %v2678_v39  ;;  %v1398_v38 = vmul.f32 %v1281_v49, %v2620_v37  ;;  %v1229_v35 = vld [vmem:[%s3508_s2 + $0x168] sm:$0xff] }
 0x1ab   : > { %v1283_v27 = vmul.f32 %v1227_v22, %v2634_v60  ;;  %v1399_v58 = vmul.f32 %v1282_v56, %v2627_v48 }
 0x1ac   : > { %v1451_v18 = vadd.f32 %v1450_v13, %v1396_v54  ;;  %v1335_v51 = vadd.f32 %v1334_v36, %v1280_v14  ;;  %v2995_v14 = vadd.f32 %v2717_v26, %v2715_v40  ;;  %v1285_v54 = vmul.f32 %v1229_v35, %v2984_v62  ;;  %v1230_v36 = vld [vmem:[%s3508_s2 + $0x170] sm:$0xff]  ;;  %v1475_v26 = vld [vmem:[%s3509_s3 + $0x8] sm:$0xff]  ;;  %v1474_v40 = vld [vmem:[%s3509_s3] sm:$0xff] }
 0x1ad   : > { %v1400_v13 = vmul.f32 %v1283_v27, %v2634_v60  ;;  %1504 = vmatpush.msrb.mxu2 %v1475_v26  ;;  %1524 = vmatpush.msrb.mxu3 %v1475_v26  ;;  %v1235_v26 = vld [vmem:[%s3508_s2 + $0x198] sm:$0xff] }
 0x1ae   : > { %v1336_v29 = vadd.f32 %v1335_v51, %v1281_v49  ;;  %v1452_v11 = vadd.f32 %v1451_v18, %v1397_v31  ;;  %v3004_v18 = vadd.f32 %v2750_v25, %v2748_v57  ;;  %v1231_v31 = vld [vmem:[%s3508_s2 + $0x178] sm:$0xff]  ;;  %v1286_v57 = vmul.f32 %v1230_v36, %v2995_v14  ;;  %v1232_v51 = vld [vmem:[%s3508_s2 + $0x180] sm:$0xff] }
 0x1af   : > { %v1402_v16 = vmul.f32 %v1285_v54, %v2984_v62  ;;  %1505 = vmatpush.msrb.mxu2 %v1474_v40  ;;  %1525 = vmatpush.msrb.mxu3 %v1474_v40 }
 0x1b0   : > { %v1337_v39 = vadd.f32 %v1336_v29, %v1282_v56  ;;  %v1453_v41 = vadd.f32 %v1452_v11, %v1398_v38  ;;  %v1401_v29 = vmul.f32 %v1284_v9, %v2640_v2  ;;  %v1030_v38 = vpop.f32.mrf.mxu2  ;;  %v1287_v35 = vmul.f32 %v1231_v31, %v3004_v18 }
 0x1b1   : > { %v3028_v11 = vadd.f32 %v2840_v21, %v2838_v10 }
 0x1b2   : > { %v1338_v49 = vadd.f32 %v1337_v39, %v1283_v27  ;;  %v1454_v22 = vadd.f32 %v1453_v41, %v1399_v58  ;;  %v3019_v58 = vadd.f32 %v2790_v20, %v2788_v45  ;;  %v1179_v27 = vpop.f32.mrf.mxu3  ;;  %v3035_v39 = vadd.f32 %v2875_v17, %v2873_v1 }
 0x1b3   : > { %v1403_v41 = vmul.f32 %v1286_v57, %v2995_v14 }
 0x1b4   : > { %v1339_v25 = vadd.f32 %v1338_v49, %v1284_v9  ;;  %v1455_v56 = vadd.f32 %v1454_v22, %v1400_v13  ;;  %v1233_v9 = vld [vmem:[%s3508_s2 + $0x188] sm:$0xff]  ;;  %v1288_v36 = vmul.f32 %v1232_v51, %v3019_v58  ;;  %v1234_v13 = vld [vmem:[%s3508_s2 + $0x190] sm:$0xff]  ;;  %v1404_v49 = vmul.f32 %v1287_v35, %v3004_v18 }
 0x1b5   : > { %v1289_v22 = vmul.f32 %v1233_v9, %v3028_v11  ;;  %v1290_v40 = vmul.f32 %v1234_v13, %v3035_v39  ;;  %v3071_v13 = vadd.f32 %v1179_v27, %v1030_v38 }
 0x1b6   : > { %v1340_v45 = vadd.f32 %v1339_v25, %v1285_v54  ;;  %v1456_v20 = vadd.f32 %v1455_v56, %v1401_v29  ;;  %v3044_v54 = vadd.f32 %v2908_v33, %v2906_v30  ;;  %v1405_v29 = vmul.f32 %v1288_v36, %v3019_v58  ;;  %v1236_v25 = vld [vmem:[%s3508_s2 + $0x1a0] sm:$0xff] }
 0x1b7   : > { %v3055_v30 = vadd.f32 %v2937_v47, %v2935_v44  ;;  %v1406_v56 = vmul.f32 %v1289_v22, %v3028_v11  ;;  %v1237_v47 = vld [vmem:[%s3508_s2 + $0x1a8] sm:$0xff] }
 0x1b8   : > { %v1341_v10 = vadd.f32 %v1340_v45, %v1286_v57  ;;  %v1457_v21 = vadd.f32 %v1456_v20, %v1402_v16  ;;  %v1291_v33 = vmul.f32 %v1235_v26, %v3044_v54  ;;  %v1407_v45 = vmul.f32 %v1290_v40, %v3035_v39  ;;  %v1032_v44 = vpop.f32.mrf.mxu2 }
 0x1ba   : > { %v1342_v1 = vadd.f32 %v1341_v10, %v1287_v35  ;;  %v1458_v17 = vadd.f32 %v1457_v21, %v1403_v41  ;;  %v3064_v35 = vadd.f32 %v2975_v63, %v2973_v61  ;;  %v1181_v20 = vpop.f32.mrf.mxu3  ;;  %v1408_v10 = vmul.f32 %v1291_v33, %v3044_v54  ;;  %v1238_v61 = vld [vmem:[%s3508_s2 + $0x1b0] sm:$0xff] }
 0x1bb   : > { %v1294_v27 = vmul.f32 %v1238_v61, %v3071_v13 }
 0x1bc   : > { %v1343_v31 = vadd.f32 %v1342_v1, %v1288_v36  ;;  %v1459_v57 = vadd.f32 %v1458_v17, %v1404_v49  ;;  %v1292_v36 = vmul.f32 %v1236_v25, %v3055_v30  ;;  %v1293_v49 = vmul.f32 %v1237_v47, %v3064_v35  ;;  %v1239_v1 = vld [vmem:[%s3508_s2 + $0x1b8] sm:$0xff] }
 0x1be   : > { %v1344_v16 = vadd.f32 %v1343_v31, %v1289_v22  ;;  %v1460_v51 = vadd.f32 %v1459_v57, %v1405_v29  ;;  %v1182_v22 = vadd.f32 %v1181_v20, %v1032_v44  ;;  %v1409_v38 = vmul.f32 %v1292_v36, %v3055_v30 }
 0x1bf   : > { %v1410_v31 = vmul.f32 %v1293_v49, %v3064_v35 }
 0x1c0   : > { %v1345_v9 = vadd.f32 %v1344_v16, %v1290_v40  ;;  %v1461_v41 = vadd.f32 %v1460_v51, %v1406_v56  ;;  %v1295_v57 = vmul.f32 %v1239_v1, %v1182_v22  ;;  %v1411_v56 = vmul.f32 %v1294_v27, %v3071_v13 }
 0x1c2   : > { %v1462_v63 = vadd.f32 %v1461_v41, %v1407_v45  ;;  %v1346_v21 = vadd.f32 %v1345_v9, %v1291_v33  ;;  %v1412_v45 = vmul.f32 %v1295_v57, %v1182_v22 }
 0x1c4   : > { %v1463_v17 = vadd.f32 %v1462_v63, %v1408_v10  ;;  %v1347_v26 = vadd.f32 %v1346_v21, %v1292_v36 }
 0x1c6   : > { %v1464_v40 = vadd.f32 %v1463_v17, %v1409_v38  ;;  %v1348_v29 = vadd.f32 %v1347_v26, %v1293_v49 }
 0x1c8   : > { %v1465_v25 = vadd.f32 %v1464_v40, %v1410_v31  ;;  %v1349_v33 = vadd.f32 %v1348_v29, %v1294_v27 }
 0x1ca   : > { %v1466_v16 = vadd.f32 %v1465_v25, %v1411_v56  ;;  %v1350_v51 = vadd.f32 %v1349_v33, %v1295_v57 }
 0x1cc   : > { %v1351_v47 = vrot.slane %v1350_v51, 4  ;;  %v1467_v44 = vadd.f32 %v1466_v16, %v1412_v45 }
 0x1ce   : > { %v1352_v20 = vadd.f32 %v1351_v47, %v1350_v51  ;;  %v1468_v9 = vrot.slane %v1467_v44, 4 }
 0x1d0   : > { %v1353_v41 = vrot.slane %v1352_v20, 2  ;;  %v1469_v36 = vadd.f32 %v1468_v9, %v1467_v44 }
 0x1d2   : > { %v1470_v10 = vrot.slane %v1469_v36, 2  ;;  %v1354_v61 = vadd.f32 %v1353_v41, %v1352_v20 }
 0x1d4   : > { %v1355_v63 = vrot.slane %v1354_v61, 1  ;;  %v1471_v21 = vadd.f32 %v1470_v10, %v1469_v36 }
 0x1d6   : > { %v1356_v17 = vadd.f32 %v1355_v63, %v1354_v61  ;;  %v1472_v49 = vrot.slane %v1471_v21, 1 }
 0x1d8   : > { %1506 = vmatmul.f32.vlgmr.msrb.gmra.mxu2 %v1356_v17  ;;  %v1473_v1 = vadd.f32 %v1472_v49, %v1471_v21 }
 0x1da   : > { %1526 = vmatmul.f32.vlgmr.msrb.gmra.mxu3 %v1473_v1 }
 0x25b   : > { %v1507_v26 = vpop.f32.mrf.mxu2 }
 0x25c   : > { %v1530_v38 = vmul.f32 0.0005787037, %v1507_v26 }
 0x25d   : > { %v1527_v27 = vpop.f32.mrf.mxu3 }
 0x25e   : > { %v1532_v40 = vmul.f32 %v1530_v38, %v1530_v38  ;;  %v1531_v29 = vmul.f32 0.0005787037, %v1527_v27  ;;  %v1545_v44 = vsub.f32 0.0, %v1530_v38  ;;  %v3561_v27 = vld [vmem:[#allocation3_spill] sm:$0xff] }
 0x260   : > { %v1533_v31 = vsub.f32 %v1531_v29, %v1532_v40  ;;  %v3562_v29 = vld [vmem:[#allocation4_spill] sm:$0xff] }
 0x262   : > { %v1534_v57 = vadd.f32 1e-05, %v1533_v31 }
 0x264   : > { %2336 = vrsqrt.f32 %v1534_v57  ;;  %vm1541_vm1 = vweird.f32 %v1534_v57 }
 0x26a   : > { %v2337_v25 = vpop.eup %2336 }
 0x26b   : > { %v1536_v33 = vmul.f32 %v2337_v25, %v1534_v57  ;;  %vm1542_vm0 = vweird.f32 %v2337_v25  ;;  %v3563_v57 = vld [vmem:[#allocation5_spill] sm:$0xff] }
 0x26c   : > { %vm1543_vm2 = vmor %vm1541_vm1, %vm1542_vm0 }
 0x26d   : > { %v1537_v56 = vmul.f32 %v2337_v25, %v1536_v33  ;;  %v3564_v33 = vld [vmem:[#allocation6_spill] sm:$0xff] }
 0x26f   : > { %v1538_v16 = vmul.f32 0.5, %v1537_v56 }
 0x271   : > { %v1539_v51 = vsub.f32 1.5, %v1538_v16 }
 0x273   : > { %v1540_v45 = vmul.f32 %v2337_v25, %v1539_v51  ;;  %v3566_v51 = vld [vmem:[#allocation8_spill] sm:$0xff] }
 0x275   : > { %v1544_v47 = vsel %vm1543_vm2, %v2337_v25, %v1540_v45 }
 0x276   : > { %v1546_v20 = vmul.f32 %v1545_v44, %v1544_v47  ;;  %v3085_v9 = vperm.slane %v1544_v47, 0  ;;  %v3567_v44 = vld [vmem:[#allocation10_spill] sm:$0xff] }
 0x278   : > { %v1597_v41 = vmul.f32 %v3085_v9, %v3028_v11  ;;  %v1598_v36 = vmul.f32 %v3085_v9, %v3035_v39  ;;  %v1599_v10 = vmul.f32 %v3085_v9, %v3044_v54  ;;  %v3093_v61 = vperm.slane %v1546_v20, 0 }
 0x279   : > { %v1600_v63 = vmul.f32 %v3085_v9, %v3055_v30  ;;  %v1601_v21 = vmul.f32 %v3085_v9, %v3064_v35  ;;  %v1602_v17 = vmul.f32 %v3085_v9, %v3071_v13  ;;  %v1603_v11 = vmul.f32 %v3085_v9, %v1182_v22 }
 0x27a   : > { %v3103_v49 = vadd.f32 %v3093_v61, %v1597_v41  ;;  %v3106_v39 = vadd.f32 %v3093_v61, %v1598_v36  ;;  %v3109_v54 = vadd.f32 %v3093_v61, %v1599_v10  ;;  %v1548_v22 = vmul.f32 %v3085_v9, %v2507_v52  ;;  %v3565_v52 = vld [vmem:[#allocation7_spill] sm:$0xff]  ;;  %v3569_v10 = vld [vmem:[#allocation12_spill] sm:$0xff] }
 0x27b   : > { %v3112_v1 = vadd.f32 %v3093_v61, %v1600_v63  ;;  %v3115_v30 = vadd.f32 %v3093_v61, %v1601_v21  ;;  %v3118_v35 = vadd.f32 %v3093_v61, %v1602_v17  ;;  %v3121_v13 = vadd.f32 %v3093_v61, %v1603_v11  ;;  %v3568_v41 = vld [vmem:[#allocation11_spill] sm:$0xff]  ;;  %v3570_v21 = vld [vmem:[#allocation13_spill] sm:$0xff] }
 0x27c   : > { %3554 = vst [vmem:[#allocation21_spill] sm:$0xff] %v3103_v49  ;;  %v1605_v26 = vadd.f32 %v3093_v61, %v1548_v22  ;;  %v1549_v38 = vmul.f32 %v3085_v9, %v2512_v0  ;;  %v1550_v40 = vmul.f32 %v3085_v9, %v3561_v27  ;;  %v1551_v31 = vmul.f32 %v3085_v9, %v3562_v29  ;;  %v3571_v22 = vld [vmem:[#allocation17_spill] sm:$0xff] }
 0x27d   : > { %3555 = vst [vmem:[#allocation22_spill] sm:$0xff] %v3106_v39  ;;  %v1552_v25 = vmul.f32 %v3085_v9, %v3563_v57  ;;  %v1553_v56 = vmul.f32 %v3085_v9, %v3564_v33  ;;  %v1554_v0 = vmul.f32 %v3085_v9, %v3565_v52  ;;  %v1555_v16 = vmul.f32 %v3085_v9, %v2552_v23  ;;  %v3572_v52 = vld [vmem:[#allocation19_spill] sm:$0xff] }
 0x27e   : > { %3556 = vst [vmem:[#allocation23_spill] sm:$0xff] %v3109_v54  ;;  %vm1661_vm3 = vcmp.ge.f32.partialorder %v1605_v26, 0.0  ;;  %v1556_v45 = vmul.f32 %v3085_v9, %v3566_v51  ;;  %v1717_v47 = vmul.f32 0.1, %v1605_v26  ;;  %v1557_v20 = vmul.f32 %v3085_v9, %v3567_v44 }
 0x27f   : > { %3557 = vst [vmem:[#allocation24_spill] sm:$0xff] %v3112_v1  ;;  %v1558_v36 = vmul.f32 %v3085_v9, %v3568_v41  ;;  %v3154_v63 = vmul.f32 %v3085_v9, %v3569_v10  ;;  %v3158_v17 = vmul.f32 %v3085_v9, %v3570_v21  ;;  %v3162_v23 = vmul.f32 %v3085_v9, %v2603_v3  ;;  %v3574_v41 = vld [vmem:[#allocation9_spill] sm:$0xff] }
 0x280   : > { %3558 = vst [vmem:[#allocation25_spill] sm:$0xff] %v3115_v30  ;;  %v3166_v11 = vmul.f32 %v3085_v9, %v2607_v15  ;;  %v3170_v27 = vmul.f32 %v3085_v9, %v3571_v22  ;;  %v1773_v29 = vsel %vm1661_vm3, %v1605_v26, %v1717_v47  ;;  %v3174_v57 = vmul.f32 %v3085_v9, %v2618_v34  ;;  %v3573_v47 = vld [vmem:[#allocation20_spill] sm:$0xff] }
 0x281   : > { %3559 = vst [vmem:[#allocation26_spill] sm:$0xff] %v3118_v35  ;;  %v3178_v33 = vmul.f32 %v3085_v9, %v2625_v43  ;;  %v3182_v3 = vmul.f32 %v3085_v9, %v2632_v55  ;;  %v3186_v15 = vmul.f32 %v3085_v9, %v2783_v42  ;;  %v3191_v26 = vmul.f32 %v3085_v9, %v2796_v53 }
 0x282   : > { %3560 = vst [vmem:[#allocation27_spill] sm:$0xff] %v3121_v13  ;;  %v3195_v34 = vmul.f32 %v3085_v9, %v3572_v52  ;;  %v3199_v43 = vmul.f32 %v3085_v9, %v2814_v59  ;;  %v3203_v55 = vmul.f32 %v3085_v9, %v2823_v50  ;;  %v3207_v42 = vmul.f32 %v3085_v9, %v2832_v6  ;;  %v3577_v52 = vld [vmem:[#allocation16_spill] sm:$0xff] }
 0x283   : > { %1829 = vst [vmem:[%s3140_s16] sm:$0xff] %v1773_v29  ;;  %v3211_v53 = vmul.f32 %v3085_v9, %v2845_v28  ;;  %v3215_v51 = vmul.f32 %v3085_v9, %v2852_v32  ;;  %v3219_v59 = vmul.f32 %v3085_v9, %v3573_v47  ;;  %v3223_v50 = vmul.f32 %v3085_v9, %v2866_v5  ;;  %v3576_v29 = vld [vmem:[#allocation15_spill] sm:$0xff] }
 0x284   : > { %v3227_v6 = vmul.f32 %v3085_v9, %v2887_v24  ;;  %v3231_v28 = vmul.f32 %v3085_v9, %v2543_v4  ;;  %v3235_v32 = vmul.f32 %v3085_v9, %v2547_v12  ;;  %v3239_v44 = vmul.f32 %v3085_v9, %v2895_v7  ;;  %v3575_v7 = vld [vmem:[#allocation14_spill] sm:$0xff] }
 0x285   : > { %v3243_v5 = vmul.f32 %v3085_v9, %v3574_v41  ;;  %v3247_v24 = vmul.f32 %v3085_v9, %v2576_v8  ;;  %v1606_v10 = vadd.f32 %v3093_v61, %v1549_v38  ;;  %v3252_v4 = vmul.f32 %v3085_v9, %v2583_v19  ;;  %v3578_v19 = vld [vmem:[#allocation18_spill] sm:$0xff] }
 0x286   : > { %v3256_v12 = vmul.f32 %v3085_v9, %v2594_v46  ;;  %v3260_v21 = vmul.f32 %v3085_v9, %v3575_v7  ;;  %v1607_v22 = vadd.f32 %v3093_v61, %v1550_v40  ;;  %v3265_v8 = vmul.f32 %v3085_v9, %v3576_v29 }
 0x287   : > { %v3269_v38 = vmul.f32 %v3085_v9, %v3577_v52  ;;  %v3273_v47 = vmul.f32 %v3085_v9, %v3578_v19  ;;  %v1608_v46 = vadd.f32 %v3093_v61, %v1551_v31  ;;  %v3278_v41 = vmul.f32 %v3085_v9, %v2620_v37 }
 0x288   : > { %v3282_v40 = vmul.f32 %v3085_v9, %v2627_v48  ;;  %v3286_v7 = vmul.f32 %v3085_v9, %v2634_v60  ;;  %v1609_v29 = vadd.f32 %v3093_v61, %v1552_v25  ;;  %v3291_v52 = vmul.f32 %v3085_v9, %v2640_v2 }
 0x289   : > { %v3295_v31 = vmul.f32 %v3085_v9, %v2984_v62  ;;  %v1610_v37 = vadd.f32 %v3093_v61, %v1553_v56  ;;  %v1718_v19 = vmul.f32 0.1, %v1606_v10  ;;  %v3300_v48 = vmul.f32 %v3085_v9, %v2995_v14 }
 0x28a   : > { %v1611_v60 = vadd.f32 %v3093_v61, %v1554_v0  ;;  %vm1662_vm4 = vcmp.ge.f32.partialorder %v1606_v10, 0.0  ;;  %v1719_v13 = vmul.f32 0.1, %v1607_v22  ;;  %v3305_v25 = vmul.f32 %v3085_v9, %v3004_v18 }
 0x28b   : > { %v1612_v2 = vadd.f32 %v3093_v61, %v1555_v16  ;;  %vm1663_vm5 = vcmp.ge.f32.partialorder %v1607_v22, 0.0  ;;  %v1720_v62 = vmul.f32 0.1, %v1608_v46  ;;  %v3310_v56 = vmul.f32 %v3085_v9, %v3019_v58 }
 0x28c   : > { %v1613_v35 = vadd.f32 %v3093_v61, %v1556_v45  ;;  %vm1664_vm6 = vcmp.ge.f32.partialorder %v1608_v46, 0.0  ;;  %v1721_v14 = vmul.f32 0.1, %v1609_v29  ;;  %v1614_v0 = vadd.f32 %v3093_v61, %v1557_v20 }
 0x28d   : > { %vm1665_vm7 = vcmp.ge.f32.partialorder %v1609_v29, 0.0  ;;  %v1722_v30 = vmul.f32 0.1, %v1610_v37  ;;  %v1774_v1 = vsel %vm1662_vm4, %v1606_v10, %v1718_v19  ;;  %v1615_v18 = vadd.f32 %v3093_v61, %v1558_v36 }
 0x28e   : > { %vm1666_vm8 = vcmp.ge.f32.partialorder %v1610_v37, 0.0  ;;  %v1723_v16 = vmul.f32 0.1, %v1611_v60  ;;  %v1775_v54 = vsel %vm1663_vm5, %v1607_v22, %v1719_v13  ;;  %v1616_v58 = vadd.f32 %v3093_v61, %v3154_v63  ;;  %1830 = vst [vmem:[%s3140_s16 + $0x8] sm:$0xff] %v1774_v1 }
 0x28f   : > { %vm1667_vm9 = vcmp.ge.f32.partialorder %v1611_v60, 0.0  ;;  %v1724_v9 = vmul.f32 0.1, %v1612_v2  ;;  %v1776_v45 = vsel %vm1664_vm6, %v1608_v46, %v1720_v62  ;;  %v1617_v20 = vadd.f32 %v3093_v61, %v3158_v17  ;;  %1831 = vst [vmem:[%s3140_s16 + $0x10] sm:$0xff] %v1775_v54 }
 0x290   : > { %vm1668_vm10 = vcmp.ge.f32.partialorder %v1612_v2, 0.0  ;;  %v1725_v39 = vmul.f32 0.1, %v1613_v35  ;;  %v1777_v49 = vsel %vm1665_vm7, %v1609_v29, %v1721_v14  ;;  %v1618_v36 = vadd.f32 %v3093_v61, %v3162_v23  ;;  %1832 = vst [vmem:[%s3140_s16 + $0x18] sm:$0xff] %v1776_v45 }
 0x291   : > { %vm1669_vm11 = vcmp.ge.f32.partialorder %v1613_v35, 0.0  ;;  %v1726_v13 = vmul.f32 0.1, %v1614_v0  ;;  %v1778_v10 = vsel %vm1666_vm8, %v1610_v37, %v1722_v30  ;;  %v1619_v63 = vadd.f32 %v3093_v61, %v3166_v11  ;;  %1833 = vst [vmem:[%s3140_s16 + $0x20] sm:$0xff] %v1777_v49 }
 0x292   : > { %vm1670_vm12 = vcmp.ge.f32.partialorder %v1614_v0, 0.0  ;;  %v1727_v22 = vmul.f32 0.1, %v1615_v18  ;;  %v1779_v17 = vsel %vm1667_vm9, %v1611_v60, %v1723_v16  ;;  %v1620_v1 = vadd.f32 %v3093_v61, %v3170_v27  ;;  %1834 = vst [vmem:[%s3140_s16 + $0x28] sm:$0xff] %v1778_v10 }
 0x293   : > { %vm1671_vm13 = vcmp.ge.f32.partialorder %v1615_v18, 0.0  ;;  %v1728_v46 = vmul.f32 0.1, %v1616_v58  ;;  %v1780_v23 = vsel %vm1668_vm10, %v1612_v2, %v1724_v9  ;;  %v1621_v54 = vadd.f32 %v3093_v61, %v3174_v57  ;;  %1835 = vst [vmem:[%s3140_s16 + $0x30] sm:$0xff] %v1779_v17 }
 0x294   : > { %vm1672_vm14 = vcmp.ge.f32.partialorder %v1616_v58, 0.0  ;;  %v1729_v30 = vmul.f32 0.1, %v1617_v20  ;;  %v1781_v11 = vsel %vm1669_vm11, %v1613_v35, %v1725_v39  ;;  %v1622_v29 = vadd.f32 %v3093_v61, %v3178_v33  ;;  %1836 = vst [vmem:[%s3140_s16 + $0x38] sm:$0xff] %v1780_v23 }
 0x295   : > { %vm1673_vm15 = vcmp.ge.f32.partialorder %v1617_v20, 0.0  ;;  %v1730_v27 = vmul.f32 0.1, %v1618_v36  ;;  %v1782_v37 = vsel %vm1670_vm12, %v1614_v0, %v1726_v13  ;;  %v1623_v49 = vadd.f32 %v3093_v61, %v3182_v3  ;;  %1837 = vst [vmem:[%s3140_s16 + $0x40] sm:$0xff] %v1781_v11 }
 0x296   : > { %vm1674_vm0 = vcmp.ge.f32.partialorder %v1618_v36, 0.0  ;;  %v1731_v57 = vmul.f32 0.1, %v1619_v63  ;;  %v1783_v19 = vsel %vm1671_vm13, %v1615_v18, %v1727_v22  ;;  %v1624_v39 = vadd.f32 %v3093_v61, %v3186_v15  ;;  %1838 = vst [vmem:[%s3140_s16 + $0x48] sm:$0xff] %v1782_v37 }
 0x297   : > { %vm1675_vm1 = vcmp.ge.f32.partialorder %v1619_v63, 0.0  ;;  %v1732_v35 = vmul.f32 0.1, %v1620_v1  ;;  %v1784_v33 = vsel %vm1672_vm14, %v1616_v58, %v1728_v46  ;;  %v1625_v60 = vadd.f32 %v3093_v61, %v3191_v26  ;;  %1839 = vst [vmem:[%s3140_s16 + $0x50] sm:$0xff] %v1783_v19 }
 0x298   : > { %vm1676_vm2 = vcmp.ge.f32.partialorder %v1620_v1, 0.0  ;;  %v1733_v3 = vmul.f32 0.1, %v1621_v54  ;;  %v1785_v2 = vsel %vm1673_vm15, %v1617_v20, %v1729_v30  ;;  %v1626_v62 = vadd.f32 %v3093_v61, %v3195_v34  ;;  %1840 = vst [vmem:[%s3140_s16 + $0x58] sm:$0xff] %v1784_v33 }
 0x299   : > { %vm1677_vm3 = vcmp.ge.f32.partialorder %v1621_v54, 0.0  ;;  %v1734_v15 = vmul.f32 0.1, %v1622_v29  ;;  %v1786_v14 = vsel %vm1674_vm0, %v1618_v36, %v1730_v27  ;;  %v1627_v0 = vadd.f32 %v3093_v61, %v3199_v43  ;;  %1841 = vst [vmem:[%s3140_s16 + $0x60] sm:$0xff] %v1785_v2 }
 0x29a   : > { %vm1678_vm4 = vcmp.ge.f32.partialorder %v1622_v29, 0.0  ;;  %v1735_v26 = vmul.f32 0.1, %v1623_v49  ;;  %v1787_v18 = vsel %vm1675_vm1, %v1619_v63, %v1731_v57  ;;  %v1628_v16 = vadd.f32 %v3093_v61, %v3203_v55  ;;  %1842 = vst [vmem:[%s3140_s16 + $0x68] sm:$0xff] %v1786_v14 }
 0x29b   : > { %vm1679_vm5 = vcmp.ge.f32.partialorder %v1623_v49, 0.0  ;;  %v1736_v34 = vmul.f32 0.1, %v1624_v39  ;;  %v1788_v58 = vsel %vm1676_vm2, %v1620_v1, %v1732_v35  ;;  %v1629_v9 = vadd.f32 %v3093_v61, %v3207_v42  ;;  %1843 = vst [vmem:[%s3140_s16 + $0x70] sm:$0xff] %v1787_v18 }
 0x29c   : > { %vm1680_vm6 = vcmp.ge.f32.partialorder %v1624_v39, 0.0  ;;  %v1737_v43 = vmul.f32 0.1, %v1625_v60  ;;  %v1789_v45 = vsel %vm1677_vm3, %v1621_v54, %v1733_v3  ;;  %v1630_v20 = vadd.f32 %v3093_v61, %v3211_v53  ;;  %1844 = vst [vmem:[%s3140_s16 + $0x78] sm:$0xff] %v1788_v58 }
 0x29d   : > { %vm1681_vm7 = vcmp.ge.f32.partialorder %v1625_v60, 0.0  ;;  %v1738_v55 = vmul.f32 0.1, %v1626_v62  ;;  %v1790_v36 = vsel %vm1678_vm4, %v1622_v29, %v1734_v15  ;;  %v1631_v13 = vadd.f32 %v3093_v61, %v3215_v51  ;;  %1845 = vst [vmem:[%s3140_s16 + $0x80] sm:$0xff] %v1789_v45 }
 0x29e   : > { %vm1682_vm8 = vcmp.ge.f32.partialorder %v1626_v62, 0.0  ;;  %v1739_v42 = vmul.f32 0.1, %v1627_v0  ;;  %v1791_v10 = vsel %vm1679_vm5, %v1623_v49, %v1735_v26  ;;  %v1632_v63 = vadd.f32 %v3093_v61, %v3219_v59  ;;  %1846 = vst [vmem:[%s3140_s16 + $0x88] sm:$0xff] %v1790_v36 }
 0x29f   : > { %vm1683_vm9 = vcmp.ge.f32.partialorder %v1627_v0, 0.0  ;;  %v1740_v53 = vmul.f32 0.1, %v1628_v16  ;;  %v1792_v22 = vsel %vm1680_vm6, %v1624_v39, %v1736_v34  ;;  %v1633_v17 = vadd.f32 %v3093_v61, %v3223_v50  ;;  %1847 = vst [vmem:[%s3140_s16 + $0x90] sm:$0xff] %v1791_v10 }
 0x2a0   : > { %vm1684_vm10 = vcmp.ge.f32.partialorder %v1628_v16, 0.0  ;;  %v1741_v51 = vmul.f32 0.1, %v1629_v9  ;;  %v1793_v1 = vsel %vm1681_vm7, %v1625_v60, %v1737_v43  ;;  %v1634_v46 = vadd.f32 %v3093_v61, %v3227_v6  ;;  %1848 = vst [vmem:[%s3140_s16 + $0x98] sm:$0xff] %v1792_v22 }
 0x2a1   : > { %vm1685_vm11 = vcmp.ge.f32.partialorder %v1629_v9, 0.0  ;;  %v1742_v59 = vmul.f32 0.1, %v1630_v20  ;;  %v1794_v23 = vsel %vm1682_vm8, %v1626_v62, %v1738_v55  ;;  %v1635_v54 = vadd.f32 %v3093_v61, %v3231_v28  ;;  %1849 = vst [vmem:[%s3140_s16 + $0xa0] sm:$0xff] %v1793_v1 }
 0x2a2   : > { %vm1686_vm12 = vcmp.ge.f32.partialorder %v1630_v20, 0.0  ;;  %v1743_v50 = vmul.f32 0.1, %v1631_v13  ;;  %v1795_v30 = vsel %vm1683_vm9, %v1627_v0, %v1739_v42  ;;  %v1636_v11 = vadd.f32 %v3093_v61, %v3235_v32  ;;  %1850 = vst [vmem:[%s3140_s16 + $0xa8] sm:$0xff] %v1794_v23 }
 0x2a3   : > { %vm1687_vm13 = vcmp.ge.f32.partialorder %v1631_v13, 0.0  ;;  %v1744_v6 = vmul.f32 0.1, %v1632_v63  ;;  %v1796_v29 = vsel %vm1684_vm10, %v1628_v16, %v1740_v53  ;;  %v1637_v27 = vadd.f32 %v3093_v61, %v3239_v44  ;;  %1851 = vst [vmem:[%s3140_s16 + $0xb0] sm:$0xff] %v1795_v30 }
 0x2a4   : > { %vm1688_vm14 = vcmp.ge.f32.partialorder %v1632_v63, 0.0  ;;  %v1745_v28 = vmul.f32 0.1, %v1633_v17  ;;  %v1797_v37 = vsel %vm1685_vm11, %v1629_v9, %v1741_v51  ;;  %v1638_v49 = vadd.f32 %v3093_v61, %v3243_v5  ;;  %1852 = vst [vmem:[%s3140_s16 + $0xb8] sm:$0xff] %v1796_v29 }
 0x2a5   : > { %vm1689_vm15 = vcmp.ge.f32.partialorder %v1633_v17, 0.0  ;;  %v1746_v32 = vmul.f32 0.1, %v1634_v46  ;;  %v1798_v57 = vsel %vm1686_vm12, %v1630_v20, %v1742_v59  ;;  %v1639_v19 = vadd.f32 %v3093_v61, %v3247_v24  ;;  %1853 = vst [vmem:[%s3140_s16 + $0xc0] sm:$0xff] %v1797_v37 }
 0x2a6   : > { %vm1690_vm0 = vcmp.ge.f32.partialorder %v1634_v46, 0.0  ;;  %v1747_v44 = vmul.f32 0.1, %v1635_v54  ;;  %v1799_v39 = vsel %vm1687_vm13, %v1631_v13, %v1743_v50  ;;  %v1640_v35 = vadd.f32 %v3093_v61, %v3252_v4  ;;  %1854 = vst [vmem:[%s3140_s16 + $0xc8] sm:$0xff] %v1798_v57  ;;  %v3579_v50 = vld [vmem:[#allocation21_spill] sm:$0xff] }
 0x2a7   : > { %vm1691_vm1 = vcmp.ge.f32.partialorder %v1635_v54, 0.0  ;;  %v1748_v5 = vmul.f32 0.1, %v1636_v11  ;;  %v1800_v33 = vsel %vm1688_vm14, %v1632_v63, %v1744_v6  ;;  %v1641_v60 = vadd.f32 %v3093_v61, %v3256_v12  ;;  %1855 = vst [vmem:[%s3140_s16 + $0xd0] sm:$0xff] %v1799_v39  ;;  %v3580_v6 = vld [vmem:[#allocation22_spill] sm:$0xff] }
 0x2a8   : > { %vm1692_vm2 = vcmp.ge.f32.partialorder %v1636_v11, 0.0  ;;  %v1749_v24 = vmul.f32 0.1, %v1637_v27  ;;  %v1801_v3 = vsel %vm1689_vm15, %v1633_v17, %v1745_v28  ;;  %v1642_v2 = vadd.f32 %v3093_v61, %v3260_v21  ;;  %1856 = vst [vmem:[%s3140_s16 + $0xd8] sm:$0xff] %v1800_v33  ;;  %v3581_v28 = vld [vmem:[#allocation23_spill] sm:$0xff] }
 0x2a9   : > { %vm1693_vm3 = vcmp.ge.f32.partialorder %v1637_v27, 0.0  ;;  %v1750_v4 = vmul.f32 0.1, %v1638_v49  ;;  %v1802_v62 = vsel %vm1690_vm0, %v1634_v46, %v1746_v32  ;;  %v1643_v15 = vadd.f32 %v3093_v61, %v3265_v8  ;;  %1857 = vst [vmem:[%s3140_s16 + $0xe0] sm:$0xff] %v1801_v3  ;;  %v3582_v32 = vld [vmem:[#allocation24_spill] sm:$0xff] }
 0x2aa   : > { %vm1694_vm4 = vcmp.ge.f32.partialorder %v1638_v49, 0.0  ;;  %v1751_v12 = vmul.f32 0.1, %v1639_v19  ;;  %v1803_v14 = vsel %vm1691_vm1, %v1635_v54, %v1747_v44  ;;  %v1644_v0 = vadd.f32 %v3093_v61, %v3269_v38  ;;  %1858 = vst [vmem:[%s3140_s16 + $0xe8] sm:$0xff] %v1802_v62  ;;  %v3583_v44 = vld [vmem:[#allocation25_spill] sm:$0xff] }
 0x2ab   : > { %vm1695_vm5 = vcmp.ge.f32.partialorder %v1639_v19, 0.0  ;;  %v1752_v21 = vmul.f32 0.1, %v1640_v35  ;;  %v1804_v26 = vsel %vm1692_vm2, %v1636_v11, %v1748_v5  ;;  %v1645_v18 = vadd.f32 %v3093_v61, %v3273_v47  ;;  %1859 = vst [vmem:[%s3140_s16 + $0xf0] sm:$0xff] %v1803_v14  ;;  %v3584_v5 = vld [vmem:[#allocation26_spill] sm:$0xff] }
 0x2ac   : > { %vm1696_vm6 = vcmp.ge.f32.partialorder %v1640_v35, 0.0  ;;  %v1753_v8 = vmul.f32 0.1, %v1641_v60  ;;  %v1805_v16 = vsel %vm1693_vm3, %v1637_v27, %v1749_v24  ;;  %v1646_v34 = vadd.f32 %v3093_v61, %v3278_v41  ;;  %1860 = vst [vmem:[%s3140_s16 + $0xf8] sm:$0xff] %v1804_v26  ;;  %v3585_v24 = vld [vmem:[#allocation27_spill] sm:$0xff] }
 0x2ad   : > { %vm1697_vm7 = vcmp.ge.f32.partialorder %v1641_v60, 0.0  ;;  %v1754_v38 = vmul.f32 0.1, %v1642_v2  ;;  %v1806_v58 = vsel %vm1694_vm4, %v1638_v49, %v1750_v4  ;;  %v1647_v9 = vadd.f32 %v3093_v61, %v3282_v40  ;;  %1861 = vst [vmem:[%s3140_s16 + $0x100] sm:$0xff] %v1805_v16 }
 0x2ae   : > { %vm1698_vm8 = vcmp.ge.f32.partialorder %v1642_v2, 0.0  ;;  %v1755_v47 = vmul.f32 0.1, %v1643_v15  ;;  %v1807_v43 = vsel %vm1695_vm5, %v1639_v19, %v1751_v12  ;;  %v1648_v45 = vadd.f32 %v3093_v61, %v3286_v7  ;;  %1862 = vst [vmem:[%s3140_s16 + $0x108] sm:$0xff] %v1806_v58 }
 0x2af   : > { %vm1699_vm9 = vcmp.ge.f32.partialorder %v1643_v15, 0.0  ;;  %v1756_v41 = vmul.f32 0.1, %v1644_v0  ;;  %v1808_v20 = vsel %vm1696_vm6, %v1640_v35, %v1752_v21  ;;  %v1649_v55 = vadd.f32 %v3093_v61, %v3291_v52  ;;  %1863 = vst [vmem:[%s3140_s16 + $0x110] sm:$0xff] %v1807_v43 }
 0x2b0   : > { %vm1700_vm10 = vcmp.ge.f32.partialorder %v1644_v0, 0.0  ;;  %v1757_v40 = vmul.f32 0.1, %v1645_v18  ;;  %v1809_v36 = vsel %vm1697_vm7, %v1641_v60, %v1753_v8  ;;  %v1650_v13 = vadd.f32 %v3093_v61, %v3295_v31  ;;  %1864 = vst [vmem:[%s3140_s16 + $0x118] sm:$0xff] %v1808_v20 }
 0x2b1   : > { %vm1701_vm11 = vcmp.ge.f32.partialorder %v1645_v18, 0.0  ;;  %v1758_v7 = vmul.f32 0.1, %v1646_v34  ;;  %v1810_v42 = vsel %vm1698_vm8, %v1642_v2, %v1754_v38  ;;  %v1651_v10 = vadd.f32 %v3093_v61, %v3300_v48  ;;  %1865 = vst [vmem:[%s3140_s16 + $0x120] sm:$0xff] %v1809_v36 }
 0x2b2   : > { %vm1702_vm12 = vcmp.ge.f32.partialorder %v1646_v34, 0.0  ;;  %v1759_v52 = vmul.f32 0.1, %v1647_v9  ;;  %v1811_v63 = vsel %vm1699_vm9, %v1643_v15, %v1755_v47  ;;  %v1652_v53 = vadd.f32 %v3093_v61, %v3305_v25  ;;  %1866 = vst [vmem:[%s3140_s16 + $0x128] sm:$0xff] %v1810_v42 }
 0x2b3   : > { %vm1703_vm13 = vcmp.ge.f32.partialorder %v1647_v9, 0.0  ;;  %v1760_v31 = vmul.f32 0.1, %v1648_v45  ;;  %v1812_v22 = vsel %vm1700_vm10, %v1644_v0, %v1756_v41  ;;  %v1653_v17 = vadd.f32 %v3093_v61, %v3310_v56  ;;  %1867 = vst [vmem:[%s3140_s16 + $0x130] sm:$0xff] %v1811_v63 }
 0x2b4   : > { %vm1704_vm14 = vcmp.ge.f32.partialorder %v1648_v45, 0.0  ;;  %v1761_v48 = vmul.f32 0.1, %v1649_v55  ;;  %v1813_v51 = vsel %vm1701_vm11, %v1645_v18, %v1757_v40  ;;  %vm1705_vm15 = vcmp.ge.f32.partialorder %v1649_v55, 0.0  ;;  %1868 = vst [vmem:[%s3140_s16 + $0x138] sm:$0xff] %v1812_v22 }
 0x2b5   : > { %v1762_v1 = vmul.f32 0.1, %v1650_v13  ;;  %v1814_v25 = vsel %vm1702_vm12, %v1646_v34, %v1758_v7  ;;  %vm1706_vm0 = vcmp.ge.f32.partialorder %v1650_v13, 0.0  ;;  %v1763_v46 = vmul.f32 0.1, %v1651_v10  ;;  %1869 = vst [vmem:[%s3140_s16 + $0x140] sm:$0xff] %v1813_v51 }
 0x2b6   : > { %v1815_v59 = vsel %vm1703_vm13, %v1647_v9, %v1759_v52  ;;  %vm1707_vm1 = vcmp.ge.f32.partialorder %v1651_v10, 0.0  ;;  %v1764_v61 = vmul.f32 0.1, %v1652_v53  ;;  %v1816_v56 = vsel %vm1704_vm14, %v1648_v45, %v1760_v31  ;;  %1870 = vst [vmem:[%s3140_s16 + $0x148] sm:$0xff] %v1814_v25 }
 0x2b7   : > { %vm1708_vm2 = vcmp.ge.f32.partialorder %v1652_v53, 0.0  ;;  %v1765_v23 = vmul.f32 0.1, %v1653_v17  ;;  %v1817_v54 = vsel %vm1705_vm15, %v1649_v55, %v1761_v48  ;;  %vm1709_vm3 = vcmp.ge.f32.partialorder %v1653_v17, 0.0  ;;  %1871 = vst [vmem:[%s3140_s16 + $0x150] sm:$0xff] %v1815_v59 }
 0x2b8   : > { %v1766_v30 = vmul.f32 0.1, %v3579_v50  ;;  %v1818_v11 = vsel %vm1706_vm0, %v1650_v13, %v1762_v1  ;;  %vm1710_vm4 = vcmp.ge.f32.partialorder %v3579_v50, 0.0  ;;  %v1767_v29 = vmul.f32 0.1, %v3580_v6  ;;  %1872 = vst [vmem:[%s3140_s16 + $0x158] sm:$0xff] %v1816_v56 }
 0x2b9   : > { %v1819_v27 = vsel %vm1707_vm1, %v1651_v10, %v1763_v46  ;;  %vm1711_vm5 = vcmp.ge.f32.partialorder %v3580_v6, 0.0  ;;  %v1768_v37 = vmul.f32 0.1, %v3581_v28  ;;  %v1820_v49 = vsel %vm1708_vm2, %v1652_v53, %v1764_v61  ;;  %1873 = vst [vmem:[%s3140_s16 + $0x160] sm:$0xff] %v1817_v54 }
 0x2ba   : > { %vm1712_vm6 = vcmp.ge.f32.partialorder %v3581_v28, 0.0  ;;  %v1769_v57 = vmul.f32 0.1, %v3582_v32  ;;  %v1821_v19 = vsel %vm1709_vm3, %v1653_v17, %v1765_v23  ;;  %1874 = vst [vmem:[%s3140_s16 + $0x168] sm:$0xff] %v1818_v11  ;;  %vm1713_vm7 = vcmp.ge.f32.partialorder %v3582_v32, 0.0 }
 0x2bb   : > { %v1770_v39 = vmul.f32 0.1, %v3583_v44  ;;  %v1822_v35 = vsel %vm1710_vm4, %v3579_v50, %v1766_v30  ;;  %1875 = vst [vmem:[%s3140_s16 + $0x170] sm:$0xff] %v1819_v27  ;;  %vm1714_vm8 = vcmp.ge.f32.partialorder %v3583_v44, 0.0  ;;  %v1771_v33 = vmul.f32 0.1, %v3584_v5 }
 0x2bc   : > { %v1823_v60 = vsel %vm1711_vm5, %v3580_v6, %v1767_v29  ;;  %1876 = vst [vmem:[%s3140_s16 + $0x178] sm:$0xff] %v1820_v49  ;;  %vm1715_vm9 = vcmp.ge.f32.partialorder %v3584_v5, 0.0  ;;  %v1772_v3 = vmul.f32 0.1, %v3585_v24  ;;  %v1824_v2 = vsel %vm1712_vm6, %v3581_v28, %v1768_v37 }
 0x2bd   : > { %1877 = vst [vmem:[%s3140_s16 + $0x180] sm:$0xff] %v1821_v19  ;;  %vm1716_vm10 = vcmp.ge.f32.partialorder %v3585_v24, 0.0  ;;  %v1825_v4 = vsel %vm1713_vm7, %v3582_v32, %v1769_v57  ;;  %v1826_v62 = vsel %vm1714_vm8, %v3583_v44, %v1770_v39  ;;  %v1827_v15 = vsel %vm1715_vm9, %v3584_v5, %v1771_v33 }
 0x2be   : > { %1878 = vst [vmem:[%s3140_s16 + $0x188] sm:$0xff] %v1822_v35  ;;  %v1828_v12 = vsel %vm1716_vm10, %v3585_v24, %v1772_v3 }
 0x2bf   : > { %1879 = vst [vmem:[%s3140_s16 + $0x190] sm:$0xff] %v1823_v60 }
 0x2c0   : > { %1880 = vst [vmem:[%s3140_s16 + $0x198] sm:$0xff] %v1824_v2 }
 0x2c1   : > { %1881 = vst [vmem:[%s3140_s16 + $0x1a0] sm:$0xff] %v1825_v4 }
 0x2c2   : > { %1882 = vst [vmem:[%s3140_s16 + $0x1a8] sm:$0xff] %v1826_v62 }
 0x2c3   : > { %1883 = vst [vmem:[%s3140_s16 + $0x1b0] sm:$0xff] %v1827_v15 }
 0x2c4   : > { %1884 = vst [vmem:[%s3140_s16 + $0x1b8] sm:$0xff] %v1828_v12 }
 0x2c5 PF: > { %s14_s15 = sadd.s32 1, %s2344_s15  }
 0x2c6   : > { %p11_p4 = scmp.ge.s32.totalorder %s14_s15, 4  }
 0x2c8   :  { %13 = sbr.rel (!%p11_p4) target bundleno = 1 (0x1), region = 66 }

</bundles_post_ra>
